<compile_context>
chip_gen: v6e
topology: v6e:2x2x1
jax: 0.10.0
libtpu: 0.0.40
codegen_flags: <defaults>
</compile_context>

<pallas_src>
import functools

import jax
import jax.numpy as jnp
from jax.experimental import pallas as pl
from jax.experimental.pallas import tpu as pltpu


# --------------------------- fused PNN forward kernel ---------------------------
def pnn_fused_kernel(x_ref, w_ref, o_ref, *, offsets, num_layers, B, T, D, H):
    """Whole-network forward in one kernel invocation (no grid).

    x_ref : [B, T, D] input (original batch_first layout).
    w_ref : [R, 4H] packed weight slab (see pack_pnn_params for layout).
    o_ref : [B, 1] output.
    """
    H4, Hh = 4 * H, H // 2

    # Layer-0 input: batch-major flatten (row = b*T + t). The minor dim is
    # preserved, so this reshape is layout-trivial; no external XLA op needed.
    layer_in = x_ref[...].reshape(B * T, D)
    batch_major = True

    h = jnp.zeros((B, H), jnp.float32)
    for l in range(num_layers):
        o_ih, o_hh, o_b = offsets["lstm"][l]
        d_in = D if l == 0 else H
        w_ih = w_ref[o_ih:o_ih + d_in, :]   # [d_in, 4H]
        w_hh = w_ref[o_hh:o_hh + H, :]      # [H, 4H]
        bias = w_ref[o_b:o_b + 1, :]        # [1, 4H]  (b_ih + b_hh combined)
        last_layer = l == num_layers - 1

        # Hoisted input projection for the whole sequence (one MXU matmul per
        # layer); the serial recurrence below only does h @ W_hh + gate math.
        gx = jnp.dot(layer_in, w_ih, preferred_element_type=jnp.float32) + bias
        if batch_major:
            gx = gx.reshape(B, T, H4)       # sublane-split; per-t slice below

        h = jnp.zeros((B, H), jnp.float32)
        c = jnp.zeros((B, H), jnp.float32)
        hs = []
        for t in range(T):
            gxt = gx[:, t, :] if batch_major else gx[t * B:(t + 1) * B, :]
            gates = gxt + jnp.dot(h, w_hh, preferred_element_type=jnp.float32)
            # Gate blocks are pre-permuted wrapper-side to (i, f, o | g):
            sg = jax.nn.sigmoid(gates[:, :3 * H])   # i, f, o
            g_g = jnp.tanh(gates[:, 3 * H:])        # g
            i_g = sg[:, 0 * H:1 * H]
            f_g = sg[:, 1 * H:2 * H]
            o_g = sg[:, 2 * H:3 * H]
            c = f_g * c + i_g * g_g
            h = o_g * jnp.tanh(c)
            if not last_layer:
                hs.append(h)

        if not last_layer:
            # Next layer's input stays in vregs: time-major concat (row = t*B + b).
            layer_in = jnp.concatenate(hs, axis=0)  # [T*B, H]
            batch_major = False

    # FC head on the last-timestep hidden state of the last layer:
    # Linear(H, H//2) -> LeakyReLU(0.01) -> Dropout (inference identity) -> Linear(H//2, 1)
    o_w1, o_b1, o_w2, o_b2 = offsets["fc"]
    w1 = w_ref[o_w1:o_w1 + H, :Hh]          # [H, H//2]
    b1 = w_ref[o_b1:o_b1 + 1, :Hh]          # [1, H//2]
    w2 = w_ref[o_w2:o_w2 + Hh, :1]          # [H//2, 1]
    b2 = w_ref[o_b2:o_b2 + 1, :1]           # [1, 1]
    z = jnp.dot(h, w1, preferred_element_type=jnp.float32) + b1
    z = jnp.where(z > 0, z, 0.01 * z)
    o_ref[...] = jnp.dot(z, w2, preferred_element_type=jnp.float32) + b2


# ----------------------------- wrapper / packing -------------------------------
def pack_pnn_params(lstm_params, fc_params, H):
    """Pack every weight/bias into ONE [R, 4H] f32 slab (a single input DMA).

    LSTM gate columns are permuted from PyTorch's (i, f, g, o) to (i, f, o, g)
    so the kernel applies sigmoid to the first 3H columns and tanh to the last
    H only.  Each tensor starts on an 8-row boundary so in-kernel slices stay
    (8,128)-tile aligned.  Done ONCE per weight set (not per forward call).
    Returns (slab, offsets).
    """
    H4 = 4 * H

    def permute_gates(w):   # columns (i,f,g,o) -> (i,f,o,g)
        return jnp.concatenate(
            [w[..., :2 * H], w[..., 3 * H:4 * H], w[..., 2 * H:3 * H]], axis=-1)

    blocks = []
    offsets = {"lstm": [], "fc": None}
    cur = [0]

    def add(m):
        r, c = m.shape
        rp = -(-r // 8) * 8  # round rows up to a multiple of 8 (sublane tile)
        blk = jnp.zeros((rp, H4), jnp.float32).at[:r, :c].set(m.astype(jnp.float32))
        blocks.append(blk)
        off = cur[0]
        cur[0] += rp
        return off

    for (w_ih, w_hh, b) in lstm_params:
        offsets["lstm"].append((add(permute_gates(w_ih)),
                                add(permute_gates(w_hh)),
                                add(permute_gates(b))))
    offsets["lstm"] = tuple(offsets["lstm"])
    offsets["fc"] = tuple(add(m) for m in fc_params)   # w1, b1, w2, b2

    slab = jnp.concatenate(blocks, axis=0)             # [R, 4H]
    return slab, offsets


def pnn_forward(x_btd, slab, offsets, *, H, num_layers):
    """x_btd: [B, T, D] (batch_first, like PyTorch). Returns [B, 1]."""
    B, T, D = x_btd.shape
    kernel = functools.partial(
        pnn_fused_kernel, offsets=offsets, num_layers=num_layers, B=B, T=T, D=D, H=H)
    vmem = pltpu.MemorySpace.VMEM
    # TODO(synk): for serving loops with fixed weights, keep the slab resident
    # across calls (cross-pallas_call weight prefetch) instead of re-DMAing it.
    return pl.pallas_call(
        kernel,
        out_shape=jax.ShapeDtypeStruct((B, 1), jnp.float32),
        in_specs=[pl.BlockSpec(memory_space=vmem),   # x  (one DMA)
                  pl.BlockSpec(memory_space=vmem)],  # packed weight slab (one DMA)
        out_specs=pl.BlockSpec(memory_space=vmem),
    )(x_btd, slab)


# ----------------------------- pure-JAX reference ------------------------------
def pnn_ref(x_btd, lstm_params, fc_params):
    B = x_btd.shape[0]
    h_in = x_btd
    for (w_ih, w_hh, b) in lstm_params:
        H = w_hh.shape[0]

        def step(carry, xt, w_ih=w_ih, w_hh=w_hh, b=b, H=H):
            h, c = carry
            g = xt @ w_ih + h @ w_hh + b[0]
            i = jax.nn.sigmoid(g[:, :H])
            f = jax.nn.sigmoid(g[:, H:2 * H])
            gg = jnp.tanh(g[:, 2 * H:3 * H])
            o = jax.nn.sigmoid(g[:, 3 * H:])
            c = f * c + i * gg
            h = o * jnp.tanh(c)
            return (h, c), h

        init = (jnp.zeros((B, H), jnp.float32), jnp.zeros((B, H), jnp.float32))
        _, ys = jax.lax.scan(step, init, jnp.transpose(h_in, (1, 0, 2)))
        h_in = jnp.transpose(ys, (1, 0, 2))
    h_last = h_in[:, -1, :]
    w1, b1, w2, b2 = fc_params
    z = h_last @ w1 + b1
    z = jnp.where(z > 0, z, 0.01 * z)
    return z @ w2 + b2


# ------------------------------------ main -------------------------------------
if __name__ == "__main__":
    B, T, D = 2, 8, 4          # batch, seq_len, input_size
    H, L = 32, 2               # hidden_size, num_layers

    key = jax.random.PRNGKey(0)
    keys = jax.random.split(key, 3 * L + 5)
    scale = 1.0 / (H ** 0.5)

    # LSTM params per layer: (w_ih [D_in,4H], w_hh [H,4H], b [1,4H]) with b = b_ih + b_hh.
    lstm_params = []
    k_i = 0
    d_in = D
    for _ in range(L):
        w_ih = jax.random.uniform(keys[k_i], (d_in, 4 * H), jnp.float32, -scale, scale); k_i += 1
        w_hh = jax.random.uniform(keys[k_i], (H, 4 * H), jnp.float32, -scale, scale); k_i += 1
        b = jax.random.uniform(keys[k_i], (1, 4 * H), jnp.float32, -scale, scale); k_i += 1
        lstm_params.append((w_ih, w_hh, b))
        d_in = H

    # FC params: Linear(H, H//2) -> LeakyReLU -> Dropout(identity) -> Linear(H//2, 1)
    w1 = jax.random.uniform(keys[k_i], (H, H // 2), jnp.float32, -scale, scale); k_i += 1
    b1 = jax.random.uniform(keys[k_i], (1, H // 2), jnp.float32, -scale, scale); k_i += 1
    w2 = jax.random.uniform(keys[k_i], (H // 2, 1), jnp.float32, -scale, scale); k_i += 1
    b2 = jax.random.uniform(keys[k_i], (1, 1), jnp.float32, -scale, scale); k_i += 1
    fc_params = (w1, b1, w2, b2)

    x = jax.random.normal(keys[k_i], (B, T, D), jnp.float32)

    # One-time weight packing (single slab -> single input DMA per forward call).
    slab, offsets = pack_pnn_params(lstm_params, fc_params, H)
    slab = jax.block_until_ready(slab)

    out = jax.block_until_ready(pnn_forward(x, slab, offsets, H=H, num_layers=L))
    ref = jax.block_until_ready(pnn_ref(x, lstm_params, fc_params))

    assert out.shape == (B, 1)
    assert jnp.allclose(out, ref, atol=1e-4, rtol=1e-4), (out, ref)

    print("KERNEL_OK")
</pallas_src>

<mosaic_0001>
module attributes {stable_mosaic.version = 11 : i64} {
  func.func @pnn_fused_kernel(%arg0: memref<2x8x4xf32, #tpu.memory_space<vmem>>, %arg1: memref<184x128xf32, #tpu.memory_space<vmem>>, %arg2: memref<2x1xf32, #tpu.memory_space<vmem>>) attributes {dimension_semantics = [], scalar_prefetch = 0 : i64, scratch_operands = 0 : i64, tpu.core_type = #tpu.core_type<tc>} {
    %c0 = arith.constant 0 : index
    %c0_0 = arith.constant 0 : index
    %c0_1 = arith.constant 0 : index
    %0 = vector.load %arg0[%c0, %c0_0, %c0_1] : memref<2x8x4xf32, #tpu.memory_space<vmem>>, vector<2x8x4xf32>
    %1 = vector.shape_cast %0 : vector<2x8x4xf32> to vector<16x4xf32>
    %c0_2 = arith.constant 0 : index
    %c0_3 = arith.constant 0 : index
    %2 = vector.load %arg1[%c0_2, %c0_3] : memref<184x128xf32, #tpu.memory_space<vmem>>, vector<4x128xf32>
    %c8 = arith.constant 8 : index
    %c0_4 = arith.constant 0 : index
    %3 = vector.load %arg1[%c8, %c0_4] : memref<184x128xf32, #tpu.memory_space<vmem>>, vector<32x128xf32>
    %c40 = arith.constant 40 : index
    %c0_5 = arith.constant 0 : index
    %4 = vector.load %arg1[%c40, %c0_5] : memref<184x128xf32, #tpu.memory_space<vmem>>, vector<1x128xf32>
    %cst = arith.constant dense<0.000000e+00> : vector<16x128xf32>
    %5 = tpu.matmul %1, %2, %cst {dimension_numbers = #tpu.dot_dimension_numbers<[1], [0], [0], [1], [0, 0, 1, 1], [], []>} : vector<16x4xf32>, vector<4x128xf32>, vector<16x128xf32> -> vector<16x128xf32>
    %6 = vector.broadcast %4 : vector<1x128xf32> to vector<16x128xf32>
    %7 = arith.addf %5, %6 : vector<16x128xf32>
    %8 = vector.shape_cast %7 : vector<16x128xf32> to vector<2x8x128xf32>
    %cst_6 = arith.constant 0.000000e+00 : f32
    %9 = vector.broadcast %cst_6 : f32 to vector<2x32xf32>
    %cst_7 = arith.constant 0.000000e+00 : f32
    %10 = vector.broadcast %cst_7 : f32 to vector<2x32xf32>
    %11 = vector.extract_strided_slice %8 {offsets = [0, 0, 0], sizes = [2, 1, 128], strides = [1, 1, 1]} : vector<2x8x128xf32> to vector<2x1x128xf32>
    %12 = vector.shape_cast %11 : vector<2x1x128xf32> to vector<2x128xf32>
    %cst_8 = arith.constant dense<0.000000e+00> : vector<2x128xf32>
    %13 = tpu.matmul %9, %3, %cst_8 {dimension_numbers = #tpu.dot_dimension_numbers<[1], [0], [0], [1], [0, 0, 1, 1], [], []>} : vector<2x32xf32>, vector<32x128xf32>, vector<2x128xf32> -> vector<2x128xf32>
    %14 = arith.addf %12, %13 : vector<2x128xf32>
    %15 = vector.extract_strided_slice %14 {offsets = [0, 0], sizes = [2, 96], strides = [1, 1]} : vector<2x128xf32> to vector<2x96xf32>
    %16 = arith.negf %15 : vector<2x96xf32>
    %17 = math.exp %16 : vector<2x96xf32>
    %cst_9 = arith.constant 1.000000e+00 : f32
    %18 = vector.broadcast %cst_9 : f32 to vector<2x96xf32>
    %19 = arith.addf %18, %17 : vector<2x96xf32>
    %20 = arith.divf %18, %19 : vector<2x96xf32>
    %21 = vector.extract_strided_slice %14 {offsets = [0, 96], sizes = [2, 32], strides = [1, 1]} : vector<2x128xf32> to vector<2x32xf32>
    %22 = math.tanh %21 : vector<2x32xf32>
    %23 = vector.extract_strided_slice %20 {offsets = [0, 0], sizes = [2, 32], strides = [1, 1]} : vector<2x96xf32> to vector<2x32xf32>
    %24 = vector.extract_strided_slice %20 {offsets = [0, 32], sizes = [2, 32], strides = [1, 1]} : vector<2x96xf32> to vector<2x32xf32>
    %25 = vector.extract_strided_slice %20 {offsets = [0, 64], sizes = [2, 32], strides = [1, 1]} : vector<2x96xf32> to vector<2x32xf32>
    %26 = arith.mulf %24, %10 : vector<2x32xf32>
    %27 = arith.mulf %23, %22 : vector<2x32xf32>
    %28 = arith.addf %26, %27 : vector<2x32xf32>
    %29 = math.tanh %28 : vector<2x32xf32>
    %30 = arith.mulf %25, %29 : vector<2x32xf32>
    %31 = vector.extract_strided_slice %8 {offsets = [0, 1, 0], sizes = [2, 1, 128], strides = [1, 1, 1]} : vector<2x8x128xf32> to vector<2x1x128xf32>
    %32 = vector.shape_cast %31 : vector<2x1x128xf32> to vector<2x128xf32>
    %cst_10 = arith.constant dense<0.000000e+00> : vector<2x128xf32>
    %33 = tpu.matmul %30, %3, %cst_10 {dimension_numbers = #tpu.dot_dimension_numbers<[1], [0], [0], [1], [0, 0, 1, 1], [], []>} : vector<2x32xf32>, vector<32x128xf32>, vector<2x128xf32> -> vector<2x128xf32>
    %34 = arith.addf %32, %33 : vector<2x128xf32>
    %35 = vector.extract_strided_slice %34 {offsets = [0, 0], sizes = [2, 96], strides = [1, 1]} : vector<2x128xf32> to vector<2x96xf32>
    %36 = arith.negf %35 : vector<2x96xf32>
    %37 = math.exp %36 : vector<2x96xf32>
    %cst_11 = arith.constant 1.000000e+00 : f32
    %38 = vector.broadcast %cst_11 : f32 to vector<2x96xf32>
    %39 = arith.addf %38, %37 : vector<2x96xf32>
    %40 = arith.divf %38, %39 : vector<2x96xf32>
    %41 = vector.extract_strided_slice %34 {offsets = [0, 96], sizes = [2, 32], strides = [1, 1]} : vector<2x128xf32> to vector<2x32xf32>
    %42 = math.tanh %41 : vector<2x32xf32>
    %43 = vector.extract_strided_slice %40 {offsets = [0, 0], sizes = [2, 32], strides = [1, 1]} : vector<2x96xf32> to vector<2x32xf32>
    %44 = vector.extract_strided_slice %40 {offsets = [0, 32], sizes = [2, 32], strides = [1, 1]} : vector<2x96xf32> to vector<2x32xf32>
    %45 = vector.extract_strided_slice %40 {offsets = [0, 64], sizes = [2, 32], strides = [1, 1]} : vector<2x96xf32> to vector<2x32xf32>
    %46 = arith.mulf %44, %28 : vector<2x32xf32>
    %47 = arith.mulf %43, %42 : vector<2x32xf32>
    %48 = arith.addf %46, %47 : vector<2x32xf32>
    %49 = math.tanh %48 : vector<2x32xf32>
    %50 = arith.mulf %45, %49 : vector<2x32xf32>
    %51 = vector.extract_strided_slice %8 {offsets = [0, 2, 0], sizes = [2, 1, 128], strides = [1, 1, 1]} : vector<2x8x128xf32> to vector<2x1x128xf32>
    %52 = vector.shape_cast %51 : vector<2x1x128xf32> to vector<2x128xf32>
    %cst_12 = arith.constant dense<0.000000e+00> : vector<2x128xf32>
    %53 = tpu.matmul %50, %3, %cst_12 {dimension_numbers = #tpu.dot_dimension_numbers<[1], [0], [0], [1], [0, 0, 1, 1], [], []>} : vector<2x32xf32>, vector<32x128xf32>, vector<2x128xf32> -> vector<2x128xf32>
    %54 = arith.addf %52, %53 : vector<2x128xf32>
    %55 = vector.extract_strided_slice %54 {offsets = [0, 0], sizes = [2, 96], strides = [1, 1]} : vector<2x128xf32> to vector<2x96xf32>
    %56 = arith.negf %55 : vector<2x96xf32>
    %57 = math.exp %56 : vector<2x96xf32>
    %cst_13 = arith.constant 1.000000e+00 : f32
    %58 = vector.broadcast %cst_13 : f32 to vector<2x96xf32>
    %59 = arith.addf %58, %57 : vector<2x96xf32>
    %60 = arith.divf %58, %59 : vector<2x96xf32>
    %61 = vector.extract_strided_slice %54 {offsets = [0, 96], sizes = [2, 32], strides = [1, 1]} : vector<2x128xf32> to vector<2x32xf32>
    %62 = math.tanh %61 : vector<2x32xf32>
    %63 = vector.extract_strided_slice %60 {offsets = [0, 0], sizes = [2, 32], strides = [1, 1]} : vector<2x96xf32> to vector<2x32xf32>
    %64 = vector.extract_strided_slice %60 {offsets = [0, 32], sizes = [2, 32], strides = [1, 1]} : vector<2x96xf32> to vector<2x32xf32>
    %65 = vector.extract_strided_slice %60 {offsets = [0, 64], sizes = [2, 32], strides = [1, 1]} : vector<2x96xf32> to vector<2x32xf32>
    %66 = arith.mulf %64, %48 : vector<2x32xf32>
    %67 = arith.mulf %63, %62 : vector<2x32xf32>
    %68 = arith.addf %66, %67 : vector<2x32xf32>
    %69 = math.tanh %68 : vector<2x32xf32>
    %70 = arith.mulf %65, %69 : vector<2x32xf32>
    %71 = vector.extract_strided_slice %8 {offsets = [0, 3, 0], sizes = [2, 1, 128], strides = [1, 1, 1]} : vector<2x8x128xf32> to vector<2x1x128xf32>
    %72 = vector.shape_cast %71 : vector<2x1x128xf32> to vector<2x128xf32>
    %cst_14 = arith.constant dense<0.000000e+00> : vector<2x128xf32>
    %73 = tpu.matmul %70, %3, %cst_14 {dimension_numbers = #tpu.dot_dimension_numbers<[1], [0], [0], [1], [0, 0, 1, 1], [], []>} : vector<2x32xf32>, vector<32x128xf32>, vector<2x128xf32> -> vector<2x128xf32>
    %74 = arith.addf %72, %73 : vector<2x128xf32>
    %75 = vector.extract_strided_slice %74 {offsets = [0, 0], sizes = [2, 96], strides = [1, 1]} : vector<2x128xf32> to vector<2x96xf32>
    %76 = arith.negf %75 : vector<2x96xf32>
    %77 = math.exp %76 : vector<2x96xf32>
    %cst_15 = arith.constant 1.000000e+00 : f32
    %78 = vector.broadcast %cst_15 : f32 to vector<2x96xf32>
    %79 = arith.addf %78, %77 : vector<2x96xf32>
    %80 = arith.divf %78, %79 : vector<2x96xf32>
    %81 = vector.extract_strided_slice %74 {offsets = [0, 96], sizes = [2, 32], strides = [1, 1]} : vector<2x128xf32> to vector<2x32xf32>
    %82 = math.tanh %81 : vector<2x32xf32>
    %83 = vector.extract_strided_slice %80 {offsets = [0, 0], sizes = [2, 32], strides = [1, 1]} : vector<2x96xf32> to vector<2x32xf32>
    %84 = vector.extract_strided_slice %80 {offsets = [0, 32], sizes = [2, 32], strides = [1, 1]} : vector<2x96xf32> to vector<2x32xf32>
    %85 = vector.extract_strided_slice %80 {offsets = [0, 64], sizes = [2, 32], strides = [1, 1]} : vector<2x96xf32> to vector<2x32xf32>
    %86 = arith.mulf %84, %68 : vector<2x32xf32>
    %87 = arith.mulf %83, %82 : vector<2x32xf32>
    %88 = arith.addf %86, %87 : vector<2x32xf32>
    %89 = math.tanh %88 : vector<2x32xf32>
    %90 = arith.mulf %85, %89 : vector<2x32xf32>
    %91 = vector.extract_strided_slice %8 {offsets = [0, 4, 0], sizes = [2, 1, 128], strides = [1, 1, 1]} : vector<2x8x128xf32> to vector<2x1x128xf32>
    %92 = vector.shape_cast %91 : vector<2x1x128xf32> to vector<2x128xf32>
    %cst_16 = arith.constant dense<0.000000e+00> : vector<2x128xf32>
    %93 = tpu.matmul %90, %3, %cst_16 {dimension_numbers = #tpu.dot_dimension_numbers<[1], [0], [0], [1], [0, 0, 1, 1], [], []>} : vector<2x32xf32>, vector<32x128xf32>, vector<2x128xf32> -> vector<2x128xf32>
    %94 = arith.addf %92, %93 : vector<2x128xf32>
    %95 = vector.extract_strided_slice %94 {offsets = [0, 0], sizes = [2, 96], strides = [1, 1]} : vector<2x128xf32> to vector<2x96xf32>
    %96 = arith.negf %95 : vector<2x96xf32>
    %97 = math.exp %96 : vector<2x96xf32>
    %cst_17 = arith.constant 1.000000e+00 : f32
    %98 = vector.broadcast %cst_17 : f32 to vector<2x96xf32>
    %99 = arith.addf %98, %97 : vector<2x96xf32>
    %100 = arith.divf %98, %99 : vector<2x96xf32>
    %101 = vector.extract_strided_slice %94 {offsets = [0, 96], sizes = [2, 32], strides = [1, 1]} : vector<2x128xf32> to vector<2x32xf32>
    %102 = math.tanh %101 : vector<2x32xf32>
    %103 = vector.extract_strided_slice %100 {offsets = [0, 0], sizes = [2, 32], strides = [1, 1]} : vector<2x96xf32> to vector<2x32xf32>
    %104 = vector.extract_strided_slice %100 {offsets = [0, 32], sizes = [2, 32], strides = [1, 1]} : vector<2x96xf32> to vector<2x32xf32>
    %105 = vector.extract_strided_slice %100 {offsets = [0, 64], sizes = [2, 32], strides = [1, 1]} : vector<2x96xf32> to vector<2x32xf32>
    %106 = arith.mulf %104, %88 : vector<2x32xf32>
    %107 = arith.mulf %103, %102 : vector<2x32xf32>
    %108 = arith.addf %106, %107 : vector<2x32xf32>
    %109 = math.tanh %108 : vector<2x32xf32>
    %110 = arith.mulf %105, %109 : vector<2x32xf32>
    %111 = vector.extract_strided_slice %8 {offsets = [0, 5, 0], sizes = [2, 1, 128], strides = [1, 1, 1]} : vector<2x8x128xf32> to vector<2x1x128xf32>
    %112 = vector.shape_cast %111 : vector<2x1x128xf32> to vector<2x128xf32>
    %cst_18 = arith.constant dense<0.000000e+00> : vector<2x128xf32>
    %113 = tpu.matmul %110, %3, %cst_18 {dimension_numbers = #tpu.dot_dimension_numbers<[1], [0], [0], [1], [0, 0, 1, 1], [], []>} : vector<2x32xf32>, vector<32x128xf32>, vector<2x128xf32> -> vector<2x128xf32>
    %114 = arith.addf %112, %113 : vector<2x128xf32>
    %115 = vector.extract_strided_slice %114 {offsets = [0, 0], sizes = [2, 96], strides = [1, 1]} : vector<2x128xf32> to vector<2x96xf32>
    %116 = arith.negf %115 : vector<2x96xf32>
    %117 = math.exp %116 : vector<2x96xf32>
    %cst_19 = arith.constant 1.000000e+00 : f32
    %118 = vector.broadcast %cst_19 : f32 to vector<2x96xf32>
    %119 = arith.addf %118, %117 : vector<2x96xf32>
    %120 = arith.divf %118, %119 : vector<2x96xf32>
    %121 = vector.extract_strided_slice %114 {offsets = [0, 96], sizes = [2, 32], strides = [1, 1]} : vector<2x128xf32> to vector<2x32xf32>
    %122 = math.tanh %121 : vector<2x32xf32>
    %123 = vector.extract_strided_slice %120 {offsets = [0, 0], sizes = [2, 32], strides = [1, 1]} : vector<2x96xf32> to vector<2x32xf32>
    %124 = vector.extract_strided_slice %120 {offsets = [0, 32], sizes = [2, 32], strides = [1, 1]} : vector<2x96xf32> to vector<2x32xf32>
    %125 = vector.extract_strided_slice %120 {offsets = [0, 64], sizes = [2, 32], strides = [1, 1]} : vector<2x96xf32> to vector<2x32xf32>
    %126 = arith.mulf %124, %108 : vector<2x32xf32>
    %127 = arith.mulf %123, %122 : vector<2x32xf32>
    %128 = arith.addf %126, %127 : vector<2x32xf32>
    %129 = math.tanh %128 : vector<2x32xf32>
    %130 = arith.mulf %125, %129 : vector<2x32xf32>
    %131 = vector.extract_strided_slice %8 {offsets = [0, 6, 0], sizes = [2, 1, 128], strides = [1, 1, 1]} : vector<2x8x128xf32> to vector<2x1x128xf32>
    %132 = vector.shape_cast %131 : vector<2x1x128xf32> to vector<2x128xf32>
    %cst_20 = arith.constant dense<0.000000e+00> : vector<2x128xf32>
    %133 = tpu.matmul %130, %3, %cst_20 {dimension_numbers = #tpu.dot_dimension_numbers<[1], [0], [0], [1], [0, 0, 1, 1], [], []>} : vector<2x32xf32>, vector<32x128xf32>, vector<2x128xf32> -> vector<2x128xf32>
    %134 = arith.addf %132, %133 : vector<2x128xf32>
    %135 = vector.extract_strided_slice %134 {offsets = [0, 0], sizes = [2, 96], strides = [1, 1]} : vector<2x128xf32> to vector<2x96xf32>
    %136 = arith.negf %135 : vector<2x96xf32>
    %137 = math.exp %136 : vector<2x96xf32>
    %cst_21 = arith.constant 1.000000e+00 : f32
    %138 = vector.broadcast %cst_21 : f32 to vector<2x96xf32>
    %139 = arith.addf %138, %137 : vector<2x96xf32>
    %140 = arith.divf %138, %139 : vector<2x96xf32>
    %141 = vector.extract_strided_slice %134 {offsets = [0, 96], sizes = [2, 32], strides = [1, 1]} : vector<2x128xf32> to vector<2x32xf32>
    %142 = math.tanh %141 : vector<2x32xf32>
    %143 = vector.extract_strided_slice %140 {offsets = [0, 0], sizes = [2, 32], strides = [1, 1]} : vector<2x96xf32> to vector<2x32xf32>
    %144 = vector.extract_strided_slice %140 {offsets = [0, 32], sizes = [2, 32], strides = [1, 1]} : vector<2x96xf32> to vector<2x32xf32>
    %145 = vector.extract_strided_slice %140 {offsets = [0, 64], sizes = [2, 32], strides = [1, 1]} : vector<2x96xf32> to vector<2x32xf32>
    %146 = arith.mulf %144, %128 : vector<2x32xf32>
    %147 = arith.mulf %143, %142 : vector<2x32xf32>
    %148 = arith.addf %146, %147 : vector<2x32xf32>
    %149 = math.tanh %148 : vector<2x32xf32>
    %150 = arith.mulf %145, %149 : vector<2x32xf32>
    %151 = vector.extract_strided_slice %8 {offsets = [0, 7, 0], sizes = [2, 1, 128], strides = [1, 1, 1]} : vector<2x8x128xf32> to vector<2x1x128xf32>
    %152 = vector.shape_cast %151 : vector<2x1x128xf32> to vector<2x128xf32>
    %cst_22 = arith.constant dense<0.000000e+00> : vector<2x128xf32>
    %153 = tpu.matmul %150, %3, %cst_22 {dimension_numbers = #tpu.dot_dimension_numbers<[1], [0], [0], [1], [0, 0, 1, 1], [], []>} : vector<2x32xf32>, vector<32x128xf32>, vector<2x128xf32> -> vector<2x128xf32>
    %154 = arith.addf %152, %153 : vector<2x128xf32>
    %155 = vector.extract_strided_slice %154 {offsets = [0, 0], sizes = [2, 96], strides = [1, 1]} : vector<2x128xf32> to vector<2x96xf32>
    %156 = arith.negf %155 : vector<2x96xf32>
    %157 = math.exp %156 : vector<2x96xf32>
    %cst_23 = arith.constant 1.000000e+00 : f32
    %158 = vector.broadcast %cst_23 : f32 to vector<2x96xf32>
    %159 = arith.addf %158, %157 : vector<2x96xf32>
    %160 = arith.divf %158, %159 : vector<2x96xf32>
    %161 = vector.extract_strided_slice %154 {offsets = [0, 96], sizes = [2, 32], strides = [1, 1]} : vector<2x128xf32> to vector<2x32xf32>
    %162 = math.tanh %161 : vector<2x32xf32>
    %163 = vector.extract_strided_slice %160 {offsets = [0, 0], sizes = [2, 32], strides = [1, 1]} : vector<2x96xf32> to vector<2x32xf32>
    %164 = vector.extract_strided_slice %160 {offsets = [0, 32], sizes = [2, 32], strides = [1, 1]} : vector<2x96xf32> to vector<2x32xf32>
    %165 = vector.extract_strided_slice %160 {offsets = [0, 64], sizes = [2, 32], strides = [1, 1]} : vector<2x96xf32> to vector<2x32xf32>
    %166 = arith.mulf %164, %148 : vector<2x32xf32>
    %167 = arith.mulf %163, %162 : vector<2x32xf32>
    %168 = arith.addf %166, %167 : vector<2x32xf32>
    %169 = math.tanh %168 : vector<2x32xf32>
    %170 = arith.mulf %165, %169 : vector<2x32xf32>
    %171 = tpu.concatenate %30, %50, %70, %90, %110, %130, %150, %170 in 0 : vector<2x32xf32>, vector<2x32xf32>, vector<2x32xf32>, vector<2x32xf32>, vector<2x32xf32>, vector<2x32xf32>, vector<2x32xf32>, vector<2x32xf32> -> vector<16x32xf32>
    %c48 = arith.constant 48 : index
    %c0_24 = arith.constant 0 : index
    %172 = vector.load %arg1[%c48, %c0_24] : memref<184x128xf32, #tpu.memory_space<vmem>>, vector<32x128xf32>
    %c80 = arith.constant 80 : index
    %c0_25 = arith.constant 0 : index
    %173 = vector.load %arg1[%c80, %c0_25] : memref<184x128xf32, #tpu.memory_space<vmem>>, vector<32x128xf32>
    %c112 = arith.constant 112 : index
    %c0_26 = arith.constant 0 : index
    %174 = vector.load %arg1[%c112, %c0_26] : memref<184x128xf32, #tpu.memory_space<vmem>>, vector<1x128xf32>
    %cst_27 = arith.constant dense<0.000000e+00> : vector<16x128xf32>
    %175 = tpu.matmul %171, %172, %cst_27 {dimension_numbers = #tpu.dot_dimension_numbers<[1], [0], [0], [1], [0, 0, 1, 1], [], []>} : vector<16x32xf32>, vector<32x128xf32>, vector<16x128xf32> -> vector<16x128xf32>
    %176 = vector.broadcast %174 : vector<1x128xf32> to vector<16x128xf32>
    %177 = arith.addf %175, %176 : vector<16x128xf32>
    %cst_28 = arith.constant 0.000000e+00 : f32
    %178 = vector.broadcast %cst_28 : f32 to vector<2x32xf32>
    %cst_29 = arith.constant 0.000000e+00 : f32
    %179 = vector.broadcast %cst_29 : f32 to vector<2x32xf32>
    %180 = vector.extract_strided_slice %177 {offsets = [0, 0], sizes = [2, 128], strides = [1, 1]} : vector<16x128xf32> to vector<2x128xf32>
    %cst_30 = arith.constant dense<0.000000e+00> : vector<2x128xf32>
    %181 = tpu.matmul %178, %173, %cst_30 {dimension_numbers = #tpu.dot_dimension_numbers<[1], [0], [0], [1], [0, 0, 1, 1], [], []>} : vector<2x32xf32>, vector<32x128xf32>, vector<2x128xf32> -> vector<2x128xf32>
    %182 = arith.addf %180, %181 : vector<2x128xf32>
    %183 = vector.extract_strided_slice %182 {offsets = [0, 0], sizes = [2, 96], strides = [1, 1]} : vector<2x128xf32> to vector<2x96xf32>
    %184 = arith.negf %183 : vector<2x96xf32>
    %185 = math.exp %184 : vector<2x96xf32>
    %cst_31 = arith.constant 1.000000e+00 : f32
    %186 = vector.broadcast %cst_31 : f32 to vector<2x96xf32>
    %187 = arith.addf %186, %185 : vector<2x96xf32>
    %188 = arith.divf %186, %187 : vector<2x96xf32>
    %189 = vector.extract_strided_slice %182 {offsets = [0, 96], sizes = [2, 32], strides = [1, 1]} : vector<2x128xf32> to vector<2x32xf32>
    %190 = math.tanh %189 : vector<2x32xf32>
    %191 = vector.extract_strided_slice %188 {offsets = [0, 0], sizes = [2, 32], strides = [1, 1]} : vector<2x96xf32> to vector<2x32xf32>
    %192 = vector.extract_strided_slice %188 {offsets = [0, 32], sizes = [2, 32], strides = [1, 1]} : vector<2x96xf32> to vector<2x32xf32>
    %193 = vector.extract_strided_slice %188 {offsets = [0, 64], sizes = [2, 32], strides = [1, 1]} : vector<2x96xf32> to vector<2x32xf32>
    %194 = arith.mulf %192, %179 : vector<2x32xf32>
    %195 = arith.mulf %191, %190 : vector<2x32xf32>
    %196 = arith.addf %194, %195 : vector<2x32xf32>
    %197 = math.tanh %196 : vector<2x32xf32>
    %198 = arith.mulf %193, %197 : vector<2x32xf32>
    %199 = vector.extract_strided_slice %177 {offsets = [2, 0], sizes = [2, 128], strides = [1, 1]} : vector<16x128xf32> to vector<2x128xf32>
    %cst_32 = arith.constant dense<0.000000e+00> : vector<2x128xf32>
    %200 = tpu.matmul %198, %173, %cst_32 {dimension_numbers = #tpu.dot_dimension_numbers<[1], [0], [0], [1], [0, 0, 1, 1], [], []>} : vector<2x32xf32>, vector<32x128xf32>, vector<2x128xf32> -> vector<2x128xf32>
    %201 = arith.addf %199, %200 : vector<2x128xf32>
    %202 = vector.extract_strided_slice %201 {offsets = [0, 0], sizes = [2, 96], strides = [1, 1]} : vector<2x128xf32> to vector<2x96xf32>
    %203 = arith.negf %202 : vector<2x96xf32>
    %204 = math.exp %203 : vector<2x96xf32>
    %cst_33 = arith.constant 1.000000e+00 : f32
    %205 = vector.broadcast %cst_33 : f32 to vector<2x96xf32>
    %206 = arith.addf %205, %204 : vector<2x96xf32>
    %207 = arith.divf %205, %206 : vector<2x96xf32>
    %208 = vector.extract_strided_slice %201 {offsets = [0, 96], sizes = [2, 32], strides = [1, 1]} : vector<2x128xf32> to vector<2x32xf32>
    %209 = math.tanh %208 : vector<2x32xf32>
    %210 = vector.extract_strided_slice %207 {offsets = [0, 0], sizes = [2, 32], strides = [1, 1]} : vector<2x96xf32> to vector<2x32xf32>
    %211 = vector.extract_strided_slice %207 {offsets = [0, 32], sizes = [2, 32], strides = [1, 1]} : vector<2x96xf32> to vector<2x32xf32>
    %212 = vector.extract_strided_slice %207 {offsets = [0, 64], sizes = [2, 32], strides = [1, 1]} : vector<2x96xf32> to vector<2x32xf32>
    %213 = arith.mulf %211, %196 : vector<2x32xf32>
    %214 = arith.mulf %210, %209 : vector<2x32xf32>
    %215 = arith.addf %213, %214 : vector<2x32xf32>
    %216 = math.tanh %215 : vector<2x32xf32>
    %217 = arith.mulf %212, %216 : vector<2x32xf32>
    %218 = vector.extract_strided_slice %177 {offsets = [4, 0], sizes = [2, 128], strides = [1, 1]} : vector<16x128xf32> to vector<2x128xf32>
    %cst_34 = arith.constant dense<0.000000e+00> : vector<2x128xf32>
    %219 = tpu.matmul %217, %173, %cst_34 {dimension_numbers = #tpu.dot_dimension_numbers<[1], [0], [0], [1], [0, 0, 1, 1], [], []>} : vector<2x32xf32>, vector<32x128xf32>, vector<2x128xf32> -> vector<2x128xf32>
    %220 = arith.addf %218, %219 : vector<2x128xf32>
    %221 = vector.extract_strided_slice %220 {offsets = [0, 0], sizes = [2, 96], strides = [1, 1]} : vector<2x128xf32> to vector<2x96xf32>
    %222 = arith.negf %221 : vector<2x96xf32>
    %223 = math.exp %222 : vector<2x96xf32>
    %cst_35 = arith.constant 1.000000e+00 : f32
    %224 = vector.broadcast %cst_35 : f32 to vector<2x96xf32>
    %225 = arith.addf %224, %223 : vector<2x96xf32>
    %226 = arith.divf %224, %225 : vector<2x96xf32>
    %227 = vector.extract_strided_slice %220 {offsets = [0, 96], sizes = [2, 32], strides = [1, 1]} : vector<2x128xf32> to vector<2x32xf32>
    %228 = math.tanh %227 : vector<2x32xf32>
    %229 = vector.extract_strided_slice %226 {offsets = [0, 0], sizes = [2, 32], strides = [1, 1]} : vector<2x96xf32> to vector<2x32xf32>
    %230 = vector.extract_strided_slice %226 {offsets = [0, 32], sizes = [2, 32], strides = [1, 1]} : vector<2x96xf32> to vector<2x32xf32>
    %231 = vector.extract_strided_slice %226 {offsets = [0, 64], sizes = [2, 32], strides = [1, 1]} : vector<2x96xf32> to vector<2x32xf32>
    %232 = arith.mulf %230, %215 : vector<2x32xf32>
    %233 = arith.mulf %229, %228 : vector<2x32xf32>
    %234 = arith.addf %232, %233 : vector<2x32xf32>
    %235 = math.tanh %234 : vector<2x32xf32>
    %236 = arith.mulf %231, %235 : vector<2x32xf32>
    %237 = vector.extract_strided_slice %177 {offsets = [6, 0], sizes = [2, 128], strides = [1, 1]} : vector<16x128xf32> to vector<2x128xf32>
    %cst_36 = arith.constant dense<0.000000e+00> : vector<2x128xf32>
    %238 = tpu.matmul %236, %173, %cst_36 {dimension_numbers = #tpu.dot_dimension_numbers<[1], [0], [0], [1], [0, 0, 1, 1], [], []>} : vector<2x32xf32>, vector<32x128xf32>, vector<2x128xf32> -> vector<2x128xf32>
    %239 = arith.addf %237, %238 : vector<2x128xf32>
    %240 = vector.extract_strided_slice %239 {offsets = [0, 0], sizes = [2, 96], strides = [1, 1]} : vector<2x128xf32> to vector<2x96xf32>
    %241 = arith.negf %240 : vector<2x96xf32>
    %242 = math.exp %241 : vector<2x96xf32>
    %cst_37 = arith.constant 1.000000e+00 : f32
    %243 = vector.broadcast %cst_37 : f32 to vector<2x96xf32>
    %244 = arith.addf %243, %242 : vector<2x96xf32>
    %245 = arith.divf %243, %244 : vector<2x96xf32>
    %246 = vector.extract_strided_slice %239 {offsets = [0, 96], sizes = [2, 32], strides = [1, 1]} : vector<2x128xf32> to vector<2x32xf32>
    %247 = math.tanh %246 : vector<2x32xf32>
    %248 = vector.extract_strided_slice %245 {offsets = [0, 0], sizes = [2, 32], strides = [1, 1]} : vector<2x96xf32> to vector<2x32xf32>
    %249 = vector.extract_strided_slice %245 {offsets = [0, 32], sizes = [2, 32], strides = [1, 1]} : vector<2x96xf32> to vector<2x32xf32>
    %250 = vector.extract_strided_slice %245 {offsets = [0, 64], sizes = [2, 32], strides = [1, 1]} : vector<2x96xf32> to vector<2x32xf32>
    %251 = arith.mulf %249, %234 : vector<2x32xf32>
    %252 = arith.mulf %248, %247 : vector<2x32xf32>
    %253 = arith.addf %251, %252 : vector<2x32xf32>
    %254 = math.tanh %253 : vector<2x32xf32>
    %255 = arith.mulf %250, %254 : vector<2x32xf32>
    %256 = vector.extract_strided_slice %177 {offsets = [8, 0], sizes = [2, 128], strides = [1, 1]} : vector<16x128xf32> to vector<2x128xf32>
    %cst_38 = arith.constant dense<0.000000e+00> : vector<2x128xf32>
    %257 = tpu.matmul %255, %173, %cst_38 {dimension_numbers = #tpu.dot_dimension_numbers<[1], [0], [0], [1], [0, 0, 1, 1], [], []>} : vector<2x32xf32>, vector<32x128xf32>, vector<2x128xf32> -> vector<2x128xf32>
    %258 = arith.addf %256, %257 : vector<2x128xf32>
    %259 = vector.extract_strided_slice %258 {offsets = [0, 0], sizes = [2, 96], strides = [1, 1]} : vector<2x128xf32> to vector<2x96xf32>
    %260 = arith.negf %259 : vector<2x96xf32>
    %261 = math.exp %260 : vector<2x96xf32>
    %cst_39 = arith.constant 1.000000e+00 : f32
    %262 = vector.broadcast %cst_39 : f32 to vector<2x96xf32>
    %263 = arith.addf %262, %261 : vector<2x96xf32>
    %264 = arith.divf %262, %263 : vector<2x96xf32>
    %265 = vector.extract_strided_slice %258 {offsets = [0, 96], sizes = [2, 32], strides = [1, 1]} : vector<2x128xf32> to vector<2x32xf32>
    %266 = math.tanh %265 : vector<2x32xf32>
    %267 = vector.extract_strided_slice %264 {offsets = [0, 0], sizes = [2, 32], strides = [1, 1]} : vector<2x96xf32> to vector<2x32xf32>
    %268 = vector.extract_strided_slice %264 {offsets = [0, 32], sizes = [2, 32], strides = [1, 1]} : vector<2x96xf32> to vector<2x32xf32>
    %269 = vector.extract_strided_slice %264 {offsets = [0, 64], sizes = [2, 32], strides = [1, 1]} : vector<2x96xf32> to vector<2x32xf32>
    %270 = arith.mulf %268, %253 : vector<2x32xf32>
    %271 = arith.mulf %267, %266 : vector<2x32xf32>
    %272 = arith.addf %270, %271 : vector<2x32xf32>
    %273 = math.tanh %272 : vector<2x32xf32>
    %274 = arith.mulf %269, %273 : vector<2x32xf32>
    %275 = vector.extract_strided_slice %177 {offsets = [10, 0], sizes = [2, 128], strides = [1, 1]} : vector<16x128xf32> to vector<2x128xf32>
    %cst_40 = arith.constant dense<0.000000e+00> : vector<2x128xf32>
    %276 = tpu.matmul %274, %173, %cst_40 {dimension_numbers = #tpu.dot_dimension_numbers<[1], [0], [0], [1], [0, 0, 1, 1], [], []>} : vector<2x32xf32>, vector<32x128xf32>, vector<2x128xf32> -> vector<2x128xf32>
    %277 = arith.addf %275, %276 : vector<2x128xf32>
    %278 = vector.extract_strided_slice %277 {offsets = [0, 0], sizes = [2, 96], strides = [1, 1]} : vector<2x128xf32> to vector<2x96xf32>
    %279 = arith.negf %278 : vector<2x96xf32>
    %280 = math.exp %279 : vector<2x96xf32>
    %cst_41 = arith.constant 1.000000e+00 : f32
    %281 = vector.broadcast %cst_41 : f32 to vector<2x96xf32>
    %282 = arith.addf %281, %280 : vector<2x96xf32>
    %283 = arith.divf %281, %282 : vector<2x96xf32>
    %284 = vector.extract_strided_slice %277 {offsets = [0, 96], sizes = [2, 32], strides = [1, 1]} : vector<2x128xf32> to vector<2x32xf32>
    %285 = math.tanh %284 : vector<2x32xf32>
    %286 = vector.extract_strided_slice %283 {offsets = [0, 0], sizes = [2, 32], strides = [1, 1]} : vector<2x96xf32> to vector<2x32xf32>
    %287 = vector.extract_strided_slice %283 {offsets = [0, 32], sizes = [2, 32], strides = [1, 1]} : vector<2x96xf32> to vector<2x32xf32>
    %288 = vector.extract_strided_slice %283 {offsets = [0, 64], sizes = [2, 32], strides = [1, 1]} : vector<2x96xf32> to vector<2x32xf32>
    %289 = arith.mulf %287, %272 : vector<2x32xf32>
    %290 = arith.mulf %286, %285 : vector<2x32xf32>
    %291 = arith.addf %289, %290 : vector<2x32xf32>
    %292 = math.tanh %291 : vector<2x32xf32>
    %293 = arith.mulf %288, %292 : vector<2x32xf32>
    %294 = vector.extract_strided_slice %177 {offsets = [12, 0], sizes = [2, 128], strides = [1, 1]} : vector<16x128xf32> to vector<2x128xf32>
    %cst_42 = arith.constant dense<0.000000e+00> : vector<2x128xf32>
    %295 = tpu.matmul %293, %173, %cst_42 {dimension_numbers = #tpu.dot_dimension_numbers<[1], [0], [0], [1], [0, 0, 1, 1], [], []>} : vector<2x32xf32>, vector<32x128xf32>, vector<2x128xf32> -> vector<2x128xf32>
    %296 = arith.addf %294, %295 : vector<2x128xf32>
    %297 = vector.extract_strided_slice %296 {offsets = [0, 0], sizes = [2, 96], strides = [1, 1]} : vector<2x128xf32> to vector<2x96xf32>
    %298 = arith.negf %297 : vector<2x96xf32>
    %299 = math.exp %298 : vector<2x96xf32>
    %cst_43 = arith.constant 1.000000e+00 : f32
    %300 = vector.broadcast %cst_43 : f32 to vector<2x96xf32>
    %301 = arith.addf %300, %299 : vector<2x96xf32>
    %302 = arith.divf %300, %301 : vector<2x96xf32>
    %303 = vector.extract_strided_slice %296 {offsets = [0, 96], sizes = [2, 32], strides = [1, 1]} : vector<2x128xf32> to vector<2x32xf32>
    %304 = math.tanh %303 : vector<2x32xf32>
    %305 = vector.extract_strided_slice %302 {offsets = [0, 0], sizes = [2, 32], strides = [1, 1]} : vector<2x96xf32> to vector<2x32xf32>
    %306 = vector.extract_strided_slice %302 {offsets = [0, 32], sizes = [2, 32], strides = [1, 1]} : vector<2x96xf32> to vector<2x32xf32>
    %307 = vector.extract_strided_slice %302 {offsets = [0, 64], sizes = [2, 32], strides = [1, 1]} : vector<2x96xf32> to vector<2x32xf32>
    %308 = arith.mulf %306, %291 : vector<2x32xf32>
    %309 = arith.mulf %305, %304 : vector<2x32xf32>
    %310 = arith.addf %308, %309 : vector<2x32xf32>
    %311 = math.tanh %310 : vector<2x32xf32>
    %312 = arith.mulf %307, %311 : vector<2x32xf32>
    %313 = vector.extract_strided_slice %177 {offsets = [14, 0], sizes = [2, 128], strides = [1, 1]} : vector<16x128xf32> to vector<2x128xf32>
    %cst_44 = arith.constant dense<0.000000e+00> : vector<2x128xf32>
    %314 = tpu.matmul %312, %173, %cst_44 {dimension_numbers = #tpu.dot_dimension_numbers<[1], [0], [0], [1], [0, 0, 1, 1], [], []>} : vector<2x32xf32>, vector<32x128xf32>, vector<2x128xf32> -> vector<2x128xf32>
    %315 = arith.addf %313, %314 : vector<2x128xf32>
    %316 = vector.extract_strided_slice %315 {offsets = [0, 0], sizes = [2, 96], strides = [1, 1]} : vector<2x128xf32> to vector<2x96xf32>
    %317 = arith.negf %316 : vector<2x96xf32>
    %318 = math.exp %317 : vector<2x96xf32>
    %cst_45 = arith.constant 1.000000e+00 : f32
    %319 = vector.broadcast %cst_45 : f32 to vector<2x96xf32>
    %320 = arith.addf %319, %318 : vector<2x96xf32>
    %321 = arith.divf %319, %320 : vector<2x96xf32>
    %322 = vector.extract_strided_slice %315 {offsets = [0, 96], sizes = [2, 32], strides = [1, 1]} : vector<2x128xf32> to vector<2x32xf32>
    %323 = math.tanh %322 : vector<2x32xf32>
    %324 = vector.extract_strided_slice %321 {offsets = [0, 0], sizes = [2, 32], strides = [1, 1]} : vector<2x96xf32> to vector<2x32xf32>
    %325 = vector.extract_strided_slice %321 {offsets = [0, 32], sizes = [2, 32], strides = [1, 1]} : vector<2x96xf32> to vector<2x32xf32>
    %326 = vector.extract_strided_slice %321 {offsets = [0, 64], sizes = [2, 32], strides = [1, 1]} : vector<2x96xf32> to vector<2x32xf32>
    %327 = arith.mulf %325, %310 : vector<2x32xf32>
    %328 = arith.mulf %324, %323 : vector<2x32xf32>
    %329 = arith.addf %327, %328 : vector<2x32xf32>
    %330 = math.tanh %329 : vector<2x32xf32>
    %331 = arith.mulf %326, %330 : vector<2x32xf32>
    %c120 = arith.constant 120 : index
    %c0_46 = arith.constant 0 : index
    %332 = vector.load %arg1[%c120, %c0_46] : memref<184x128xf32, #tpu.memory_space<vmem>>, vector<32x16xf32>
    %c152 = arith.constant 152 : index
    %c0_47 = arith.constant 0 : index
    %333 = vector.load %arg1[%c152, %c0_47] : memref<184x128xf32, #tpu.memory_space<vmem>>, vector<1x16xf32>
    %c160 = arith.constant 160 : index
    %c0_48 = arith.constant 0 : index
    %334 = vector.load %arg1[%c160, %c0_48] : memref<184x128xf32, #tpu.memory_space<vmem>>, vector<16x1xf32>
    %c176 = arith.constant 176 : index
    %c0_49 = arith.constant 0 : index
    %335 = vector.load %arg1[%c176, %c0_49] : memref<184x128xf32, #tpu.memory_space<vmem>>, vector<1x1xf32>
    %cst_50 = arith.constant dense<0.000000e+00> : vector<2x16xf32>
    %336 = tpu.matmul %331, %332, %cst_50 {dimension_numbers = #tpu.dot_dimension_numbers<[1], [0], [0], [1], [0, 0, 1, 1], [], []>} : vector<2x32xf32>, vector<32x16xf32>, vector<2x16xf32> -> vector<2x16xf32>
    %337 = vector.broadcast %333 : vector<1x16xf32> to vector<2x16xf32>
    %338 = arith.addf %336, %337 : vector<2x16xf32>
    %cst_51 = arith.constant 0.000000e+00 : f32
    %339 = vector.broadcast %cst_51 : f32 to vector<2x16xf32>
    %340 = arith.cmpf ogt, %338, %339 : vector<2x16xf32>
    %cst_52 = arith.constant 0.00999999977 : f32
    %341 = vector.broadcast %cst_52 : f32 to vector<2x16xf32>
    %342 = arith.mulf %341, %338 : vector<2x16xf32>
    %343 = arith.select %340, %338, %342 : vector<2x16xi1>, vector<2x16xf32>
    %cst_53 = arith.constant dense<0.000000e+00> : vector<2x1xf32>
    %344 = tpu.matmul %343, %334, %cst_53 {dimension_numbers = #tpu.dot_dimension_numbers<[1], [0], [0], [1], [0, 0, 1, 1], [], []>} : vector<2x16xf32>, vector<16x1xf32>, vector<2x1xf32> -> vector<2x1xf32>
    %345 = vector.broadcast %335 : vector<1x1xf32> to vector<2x1xf32>
    %346 = arith.addf %344, %345 : vector<2x1xf32>
    %c0_54 = arith.constant 0 : index
    %c0_55 = arith.constant 0 : index
    %347 = vector.load %arg2[%c0_54, %c0_55] : memref<2x1xf32, #tpu.memory_space<vmem>>, vector<2x1xf32>
    tpu.vector_store %arg2[%c0_54, %c0_55], %346 {strides = array<i32>} : memref<2x1xf32, #tpu.memory_space<vmem>>, vector<2x1xf32>,
    return
  }
}

</mosaic_0001>

<bundles_post_ra>
// kernel: tpu_custom_call.1
= control target key start
LH: loop header
LB: loop body
LE: loop exit
PB: predicated region body
PF: predicated region fallthrough
CT: control target
= control target key end

     0   :  { %7 = vsyncpa [#allocation3], 0  ;;  %s2957_s9 = smov [#allocation2]   ;;  %s3378_s0 = inlined_call_operand.vmem [shape: f32[2,8,4], index: 0, kind: input, shape index: {}]   ;;  %s3379_s1 = inlined_call_operand.hbm [shape: f32[184,128], index: 1, kind: input, shape index: {}]   ;;  %s3380_s2 = inlined_call_operand.vmem [shape: f32[2,1], index: 2, kind: output, shape index: {}]  }
   0x1   :  { %s15_s10 = sshll.u32 %s2957_s9, 4  ;;  %s16_s10 = int_to_ptr.vmem [resolvable:$true] %s15_s10 }
   0x2   :  { %s2943_s11 = scalar_lea.vmem %s16_s10, 2944  ;;  %p2948_p1 = scmp.lt.s32.totalorder %s16_s10, %s16_s10 }
   0x3   :  { %p2944_p0 = scmp.ne.s32.totalorder %s16_s10, %s2943_s11  ;;  %p2949_p2 = scmp.lt.s32.totalorder %s2943_s11, %s2943_s11 }
   0x5   :  { %p2950_p3 = por %p2949_p2, %p2948_p1 }
   0x7   :  { %p2951_p4 = pnand %p2950_p3, %p2944_p0 }
   0x9   :  { %2954 = shalt.err (!%p2951_p4)
}
   0xa   :  { %s2958_s12 = smov 128   ;;  %s2959_s13 = smov 8  }
   0xb   :  { %21 = dma.hbm_to_vmem [thread:$0]  %s3379_s1, 2944, %s16_s10, [#allocation3], %s2958_s12, %s2958_s12, %s2959_s13  }
   0xc   :  { %2955 = dma.done.wait [#allocation3], 2944  }
   0xd   :  { %2956 = vsyncadd [#allocation3], 4294964352  ;;  %v2960_v0 = vmov 0.0   ;;  %vm2961_vm0 = vmmov 0   ;;  %vm44_vm1 = vcmask 1043456   ;;  %v2985_v1 = vld [vmem:[#allocation2 + $0x20] sm:$0xff] }
   0xe   :  { %2531 = vmatprep.subr.mxu1 %v2960_v0  ;;  %2539 = vmatprep.mubr.msk.f32.mxu1 %vm2961_vm0, %v2960_v0  ;;  %v27_v2 = vld [vmem:[#allocation2] sm:$0xf]  ;;  %vm37_vm2 = vcmask 31744   ;;  %v2992_v4 = vld [vmem:[#allocation2 + $0x18] sm:$0xff]  ;;  %v26_v5 = vld [vmem:[%s3378_s0 + $0x8] sm:$0xff]  ;;  %vm254_vm3 = vcmask 1041409  }
   0xf   :  { %v25_v3 = vld [vmem:[%s3378_s0] sm:$0xff]  ;;  %2532 = vmatpush3.msra.mxu1 %v2985_v1  ;;  %2526 = vmatprep.subr.msk.mxu0 %vm44_vm1, %v27_v2  ;;  %v2999_v6 = vld [vmem:[#allocation2 + $0x10] sm:$0xff]  ;;  %v3003_v7 = vld [vmem:[#allocation2 + $0x8] sm:$0xff]  ;;  %s2962_s0 = smov 32   ;;  %s2963_s19 = smov 64   ;;  %vm123_vm4 = vcmask 261120  }
  0x10   :  { %2533 = vmatprep.subr.mxu1 %v2960_v0  ;;  %2527 = vmatpush3.msk.msra.mxu0 %vm44_vm1, %v27_v2  ;;  %v2380_v9 = vld [vmem:[#allocation2 + $0x28] ss:$0 sm:$0xff]  ;;  %vm1232_vm5 = vcmask 1043459   ;;  %vm1237_vm6 = vcmask 1045509   ;;  %vm1259_vm7 = vcmask 1041408   ;;  %vm1242_vm8 = vcmask 1047559  }
  0x11   :  { %2528 = vmatprep.mubr.msk.f32.mxu0 %vm37_vm2, %v25_v3  ;;  %2534 = vmatpush3.msra.mxu1 %v2992_v4  ;;  %vm1262_vm9 = vcmask 1045504   ;;  %vm2299_vm11 = vcmask 130048   ;;  %vm2373_vm12 = vcmask 1024  }
  0x12   :  { %2529 = vmatmul.mubr.msk.f32.vlgmr.msra.gmra.mxu0 %vm37_vm2, %v26_v5  ;;  %2535 = vmatprep.subr.mxu1 %v2960_v0 }
  0x13   :  { %2536 = vmatpush3.msra.mxu1 %v2999_v6  ;;  %2542 = vmatprep.subr.mxu0 %v2960_v0 }
  0x14   :  { %2537 = vmatprep.subr.mxu1 %v2960_v0  ;;  %2543 = vmatpush3.msra.mxu0 %v2985_v1 }
  0x15   :  { %2538 = vmatpush3.msra.mxu1 %v3003_v7  ;;  %2544 = vmatprep.subr.mxu0 %v2960_v0 }
  0x16   :  { %2540 = vmatmul.mubr.f32.vlgmr.msra.gmra.mxu1 %v2960_v0  ;;  %2545 = vmatpush3.msra.mxu0 %v2992_v4 }
  0x17   :  { %2546 = vmatprep.subr.mxu0 %v2960_v0  ;;  %2550 = vmatprep.mubr.msk.f32.mxu0 %vm2961_vm0, %v2960_v0 }
  0x18   :  { %2547 = vmatpush3.msra.mxu0 %v2999_v6  ;;  %2553 = vmatprep.subr.mxu1 %v2960_v0 }
  0x19   :  { %2548 = vmatprep.subr.mxu0 %v2960_v0  ;;  %2554 = vmatpush3.msra.mxu1 %v2985_v1 }
  0x1a   :  { %2549 = vmatpush3.msra.mxu0 %v3003_v7  ;;  %2555 = vmatprep.subr.mxu1 %v2960_v0 }
  0x1b   :  { %2556 = vmatpush3.msra.mxu1 %v2992_v4  ;;  %2561 = vmatprep.mubr.msk.f32.mxu1 %vm2961_vm0, %v2960_v0 }
  0x1c   :  { %2557 = vmatprep.subr.mxu1 %v2960_v0  ;;  %2564 = vmatprep.subr.mxu0 %v2960_v0 }
  0x1d   :  { %2558 = vmatpush3.msra.mxu1 %v2999_v6 }
  0x1e   :  { %2559 = vmatprep.subr.mxu1 %v2960_v0 }
  0x1f   :  { %2560 = vmatpush3.msra.mxu1 %v3003_v7 }
  0x20   :  { %2575 = vmatprep.subr.mxu1 %v2960_v0 }
  0xd2   :  { %v2530_v8 = vpop.f32.mrf.mxu0 }
  0xd3   :  { %v3031_v10 = vadd.f32 %v2530_v8, %v2380_v9 }
  0xd4   :  { %v114_v11 = vpop.f32.mrf.mxu0 }
  0xd5   :  { %v3033_v14 = vadd.f32 %v2380_v9, %v114_v11 }
  0xd6   :  { %v193_v12 = vpop.f32.mrf.mxu1 }
  0xd7   :  { %v198_v13 = vrot.slane %v193_v12, 1  ;;  %v201_v17 = vadd.f32 %v193_v12, %v3033_v14 }
  0xd8   :  { %v2541_v15 = vpop.f32.mrf.mxu1 }
  0xd9   :  { %v202_v16 = vadd.f32 %v198_v13, %v3031_v10  ;;  %v2384_v21 = vmul.f32 -1.442695, %v201_v17 }
  0xdb   :  { %2743 = vtanh.f32 %v202_v16  ;;  %v2385_v20 = vmul.f32 -1.442695, %v202_v16 }
  0xdc   :  { %2745 = vtanh.f32 %v201_v17 }
  0xdd   :  { %2747 = vpow2.f32 %v2385_v20 }
  0xde   :  { %2749 = vpow2.f32 %v2384_v21 }
  0xe8   :  { %v2744_v18 = vpop.eup %2743 }
  0xe9   :  { %223 = vrot.lane.b32.xlu0 %v2744_v18, %s2962_s0  ;;  %v2746_v19 = vpop.eup %2745 }
  0xea   :  { %v2748_v22 = vpop.eup %2747 }
  0xeb   :  { %v210_v23 = vadd.f32 1.0, %v2748_v22  ;;  %v2750_v24 = vpop.eup %2749 }
  0xec   :  { %v209_v25 = vadd.f32 1.0, %v2750_v24 }
  0xed   :  { %221 = vrot.lane.b32.xlu0 %v2746_v19, %s2962_s0  ;;  %2751 = vrcp.f32 %v210_v23 }
  0xee   :  { %2753 = vrcp.f32 %v209_v25 }
  0xfa   :  { %v2752_v26 = vpop.eup %2751 }
  0xfb   :  { %v2754_v29 = vpop.eup %2753  ;;  %v218_v32 = vmul.f32 0.0, %v2752_v26 }
  0xfc   :  { %v217_v35 = vmul.f32 0.0, %v2754_v29 }
 0x15b   :  { %v224_v27 = vpop.permute.xlu0 %223 }
 0x15c   :  { %v228_v28 = vmul.f32 %v2752_v26, %v224_v27 }
 0x15e   :  { %233 = vrot.lane.b32.xlu1 %v228_v28, %s2962_s0 }
 0x15f   :  { %v222_v30 = vpop.permute.xlu0 %221 }
 0x160   :  { %v227_v31 = vmul.f32 %v2754_v29, %v222_v30 }
 0x162   :  { %231 = vrot.lane.b32.xlu1 %v227_v31, %s2962_s0 }
 0x1d0   :  { %v234_v33 = vpop.permute.xlu1 %233 }
 0x1d1   :  { %v238_v34 = vadd.f32 %v234_v33, %v218_v32 }
 0x1d3   :  { %2755 = vtanh.f32 %v238_v34  ;;  %v353_v5 = vrot.slane %v238_v34, 7 }
 0x1d4   :  { %v232_v36 = vpop.permute.xlu1 %231 }
 0x1d5   :  { %v237_v37 = vadd.f32 %v232_v36, %v217_v35 }
 0x1d7   :  { %2757 = vtanh.f32 %v237_v37  ;;  %v352_v9 = vrot.slane %v237_v37, 7 }
 0x1e0   :  { %v2756_v38 = vpop.eup %2755 }
 0x1e1   :  { %245 = vrot.lane.b32.xlu0 %v2756_v38, %s2962_s0 }
 0x1e4   :  { %v2758_v39 = vpop.eup %2757 }
 0x1e5   :  { %243 = vrot.lane.b32.xlu1 %v2758_v39, %s2962_s0 }
 0x253   :  { %v246_v40 = vpop.permute.xlu0 %245 }
 0x254   :  { %v250_v41 = vmul.f32 %v2752_v26, %v246_v40 }
 0x256   :  { %v253_v43 = vrot.slane %v250_v41, 7 }
 0x257   :  { %v244_v42 = vpop.permute.xlu1 %243 }
 0x258   :  { %v249_v44 = vmul.f32 %v2754_v29, %v244_v42 }
 0x25a   :  { %v3044_v45 = vsel %vm254_vm3, %v253_v43, %v249_v44 }
 0x25b   :  { %256 = vrot.lane.b32.xlu0 %v3044_v45, %s2963_s19 }
 0x2cd   :  { %v257_v46 = vpop.permute.xlu0 %256 }
 0x2ce   :  { %2551 = vmatmul.mubr.msk.f32.vlgmr.msra.gmra.mxu0 %vm123_vm4, %v257_v46 }
 0x2cf   :  { %2565 = vmatpush3.msra.mxu0 %v2985_v1  ;;  %2572 = vmatprep.mubr.msk.f32.mxu0 %vm2961_vm0, %v2960_v0 }
 0x2d0   :  { %2566 = vmatprep.subr.mxu0 %v2960_v0 }
 0x2d1   :  { %2567 = vmatpush3.msra.mxu0 %v2992_v4 }
 0x2d2   :  { %2568 = vmatprep.subr.mxu0 %v2960_v0 }
 0x2d3   :  { %2569 = vmatpush3.msra.mxu0 %v2999_v6 }
 0x2d4   :  { %2570 = vmatprep.subr.mxu0 %v2960_v0 }
 0x2d5   :  { %2571 = vmatpush3.msra.mxu0 %v3003_v7 }
 0x2d6   :  { %2586 = vmatprep.subr.mxu0 %v2960_v0 }
 0x38e   :  { %v326_v47 = vpop.f32.mrf.mxu0 }
 0x38f   :  { %v331_v48 = vrot.slane %v326_v47, 7  ;;  %v335_v49 = vadd.f32 %v326_v47, %v3031_v10 }
 0x390   :  { %v2552_v50 = vpop.f32.mrf.mxu0 }
 0x391   :  { %v334_v51 = vadd.f32 %v331_v48, %v3033_v14  ;;  %2759 = vtanh.f32 %v335_v49  ;;  %v2388_v54 = vmul.f32 -1.442695, %v335_v49 }
 0x393   :  { %2761 = vtanh.f32 %v334_v51  ;;  %v2387_v55 = vmul.f32 -1.442695, %v334_v51 }
 0x394   :  { %2763 = vpow2.f32 %v2388_v54 }
 0x395   :  { %2765 = vpow2.f32 %v2387_v55 }
 0x39e   :  { %v2760_v52 = vpop.eup %2759 }
 0x39f   :  { %362 = vrot.lane.b32.xlu0 %v2760_v52, %s2962_s0 }
 0x3a0   :  { %v2762_v53 = vpop.eup %2761 }
 0x3a1   :  { %360 = vrot.lane.b32.xlu1 %v2762_v53, %s2962_s0  ;;  %v2764_v56 = vpop.eup %2763 }
 0x3a2   :  { %v2766_v57 = vpop.eup %2765  ;;  %v343_v58 = vadd.f32 1.0, %v2764_v56 }
 0x3a3   :  { %v342_v59 = vadd.f32 1.0, %v2766_v57 }
 0x3a4   :  { %2767 = vrcp.f32 %v343_v58 }
 0x3a5   :  { %2769 = vrcp.f32 %v342_v59 }
 0x3b1   :  { %v2768_v60 = vpop.eup %2767 }
 0x3b2   :  { %v2770_v63 = vpop.eup %2769  ;;  %v357_v8 = vmul.f32 %v2768_v60, %v353_v5 }
 0x3b3   :  { %v356_v13 = vmul.f32 %v2770_v63, %v352_v9 }
 0x411   :  { %v363_v61 = vpop.permute.xlu0 %362 }
 0x412   :  { %v367_v62 = vmul.f32 %v2768_v60, %v363_v61 }
 0x413   :  { %v361_v2 = vpop.permute.xlu1 %360 }
 0x414   :  { %372 = vrot.lane.b32.xlu0 %v367_v62, %s2962_s0  ;;  %v366_v3 = vmul.f32 %v2770_v63, %v361_v2 }
 0x416   :  { %370 = vrot.lane.b32.xlu1 %v366_v3, %s2962_s0 }
 0x486   :  { %v373_v11 = vpop.permute.xlu0 %372 }
 0x487   :  { %v3065_v12 = vadd.f32 %v373_v11, %v357_v8 }
 0x488   :  { %v371_v15 = vpop.permute.xlu1 %370 }
 0x489   :  { %2771 = vtanh.f32 %v3065_v12  ;;  %v376_v16 = vadd.f32 %v371_v15, %v356_v13  ;;  %v492_v51 = vrot.slane %v3065_v12, 7 }
 0x48b   :  { %2773 = vtanh.f32 %v376_v16  ;;  %v491_v50 = vrot.slane %v376_v16, 7 }
 0x496   :  { %v2772_v17 = vpop.eup %2771 }
 0x497   :  { %384 = vrot.lane.b32.xlu0 %v2772_v17, %s2962_s0 }
 0x498   :  { %v2774_v18 = vpop.eup %2773 }
 0x499   :  { %382 = vrot.lane.b32.xlu1 %v2774_v18, %s2962_s0 }
 0x509   :  { %v385_v19 = vpop.permute.xlu0 %384 }
 0x50a   :  { %v389_v20 = vmul.f32 %v2768_v60, %v385_v19 }
 0x50b   :  { %v383_v21 = vpop.permute.xlu1 %382 }
 0x50c   :  { %v388_v22 = vmul.f32 %v2770_v63, %v383_v21  ;;  %v1231_v23 = vrot.slane %v389_v20, 6 }
 0x50e   :  { %v392_v24 = vrot.slane %v388_v22, 1  ;;  %v1230_v25 = vrot.slane %v388_v22, 7 }
 0x510   :  { %v3071_v26 = vsel %vm1232_vm5, %v1231_v23, %v1230_v25  ;;  %v393_v27 = vsel %vm254_vm3, %v389_v20, %v392_v24 }
 0x511   :  { %394 = vrot.lane.b32.xlu1 %v393_v27, %s2963_s19  ;;  %v1260_v12 = vsel %vm1259_vm7, %v3044_v45, %v3071_v26 }
 0x583   :  { %v395_v28 = vpop.permute.xlu1 %394 }
 0x584   :  { %2562 = vmatmul.mubr.msk.f32.vlgmr.msra.gmra.mxu1 %vm123_vm4, %v395_v28 }
 0x585   :  { %2576 = vmatpush3.msra.mxu1 %v2985_v1  ;;  %2583 = vmatprep.mubr.msk.f32.mxu1 %vm2961_vm0, %v2960_v0 }
 0x586   :  { %2577 = vmatprep.subr.mxu1 %v2960_v0 }
 0x587   :  { %2578 = vmatpush3.msra.mxu1 %v2992_v4 }
 0x588   :  { %2579 = vmatprep.subr.mxu1 %v2960_v0 }
 0x589   :  { %2580 = vmatpush3.msra.mxu1 %v2999_v6 }
 0x58a   :  { %2581 = vmatprep.subr.mxu1 %v2960_v0 }
 0x58b   :  { %2582 = vmatpush3.msra.mxu1 %v3003_v7 }
 0x58c   :  { %2597 = vmatprep.subr.mxu1 %v2960_v0 }
 0x644   :  { %v464_v29 = vpop.f32.mrf.mxu1 }
 0x645   :  { %v469_v30 = vrot.slane %v464_v29, 6  ;;  %v470_v31 = vrot.slane %v464_v29, 7 }
 0x646   :  { %v2563_v32 = vpop.f32.mrf.mxu1 }
 0x647   :  { %v473_v33 = vadd.f32 %v469_v30, %v3033_v14  ;;  %v474_v34 = vadd.f32 %v470_v31, %v3031_v10 }
 0x649   :  { %2775 = vtanh.f32 %v473_v33  ;;  %v2390_v37 = vmul.f32 -1.442695, %v473_v33  ;;  %v2391_v38 = vmul.f32 -1.442695, %v474_v34 }
 0x64a   :  { %2777 = vtanh.f32 %v474_v34 }
 0x64b   :  { %2779 = vpow2.f32 %v2390_v37 }
 0x64c   :  { %2781 = vpow2.f32 %v2391_v38 }
 0x656   :  { %v2776_v35 = vpop.eup %2775 }
 0x657   :  { %v2778_v36 = vpop.eup %2777  ;;  %499 = vrot.lane.b32.xlu0 %v2776_v35, %s2962_s0 }
 0x658   :  { %501 = vrot.lane.b32.xlu1 %v2778_v36, %s2962_s0  ;;  %v2780_v39 = vpop.eup %2779 }
 0x659   :  { %v2782_v40 = vpop.eup %2781  ;;  %v481_v41 = vadd.f32 1.0, %v2780_v39 }
 0x65a   :  { %v482_v42 = vadd.f32 1.0, %v2782_v40 }
 0x65b   :  { %2783 = vrcp.f32 %v481_v41 }
 0x65c   :  { %2785 = vrcp.f32 %v482_v42 }
 0x668   :  { %v2784_v43 = vpop.eup %2783 }
 0x669   :  { %v2786_v46 = vpop.eup %2785  ;;  %v495_v52 = vmul.f32 %v2784_v43, %v491_v50 }
 0x66a   :  { %v496_v53 = vmul.f32 %v2786_v46, %v492_v51 }
 0x6c9   :  { %v500_v44 = vpop.permute.xlu0 %499 }
 0x6ca   :  { %v502_v47 = vpop.permute.xlu1 %501  ;;  %v505_v48 = vmul.f32 %v2784_v43, %v500_v44 }
 0x6cb   :  { %v506_v49 = vmul.f32 %v2786_v46, %v502_v47 }
 0x6cc   :  { %509 = vrot.lane.b32.xlu0 %v505_v48, %s2962_s0 }
 0x6cd   :  { %511 = vrot.lane.b32.xlu1 %v506_v49, %s2962_s0 }
 0x73e   :  { %v510_v54 = vpop.permute.xlu0 %509 }
 0x73f   :  { %v512_v55 = vpop.permute.xlu1 %511  ;;  %v3093_v56 = vadd.f32 %v510_v54, %v495_v52 }
 0x740   :  { %v3095_v57 = vadd.f32 %v512_v55, %v496_v53 }
 0x741   :  { %2787 = vtanh.f32 %v3093_v56  ;;  %v631_v35 = vrot.slane %v3093_v56, 7 }
 0x742   :  { %2789 = vtanh.f32 %v3095_v57  ;;  %v632_v36 = vrot.slane %v3095_v57, 7 }
 0x74e   :  { %v2788_v58 = vpop.eup %2787 }
 0x74f   :  { %v2790_v59 = vpop.eup %2789  ;;  %521 = vrot.lane.b32.xlu0 %v2788_v58, %s2962_s0 }
 0x750   :  { %523 = vrot.lane.b32.xlu1 %v2790_v59, %s2962_s0 }
 0x7c1   :  { %v522_v60 = vpop.permute.xlu0 %521 }
 0x7c2   :  { %v524_v61 = vpop.permute.xlu1 %523  ;;  %v527_v62 = vmul.f32 %v2784_v43, %v522_v60 }
 0x7c3   :  { %v528_v63 = vmul.f32 %v2786_v46, %v524_v61 }
 0x7c4   :  { %v531_v2 = vrot.slane %v527_v62, 2  ;;  %v1235_v3 = vrot.slane %v527_v62, 6 }
 0x7c5   :  { %v532_v5 = vrot.slane %v528_v63, 1  ;;  %v1236_v8 = vrot.slane %v528_v63, 5 }
 0x7c7   :  { %v533_v9 = vsel %vm254_vm3, %v532_v5, %v531_v2  ;;  %v1238_v11 = vsel %vm1237_vm6, %v1236_v8, %v1235_v3 }
 0x7c8   :  { %534 = vrot.lane.b32.xlu0 %v533_v9, %s2963_s19  ;;  %v3108_v13 = vsel %vm44_vm1, %v1260_v12, %v1238_v11 }
 0x83a   :  { %v535_v15 = vpop.permute.xlu0 %534 }
 0x83b   :  { %2573 = vmatmul.mubr.msk.f32.vlgmr.msra.gmra.mxu0 %vm123_vm4, %v535_v15 }
 0x83c   :  { %2587 = vmatpush3.msra.mxu0 %v2985_v1  ;;  %2594 = vmatprep.mubr.msk.f32.mxu0 %vm2961_vm0, %v2960_v0 }
 0x83d   :  { %2588 = vmatprep.subr.mxu0 %v2960_v0 }
 0x83e   :  { %2589 = vmatpush3.msra.mxu0 %v2992_v4 }
 0x83f   :  { %2590 = vmatprep.subr.mxu0 %v2960_v0 }
 0x840   :  { %2591 = vmatpush3.msra.mxu0 %v2999_v6 }
 0x841   :  { %2592 = vmatprep.subr.mxu0 %v2960_v0 }
 0x842   :  { %2593 = vmatpush3.msra.mxu0 %v3003_v7 }
 0x843   :  { %2608 = vmatprep.subr.mxu0 %v2960_v0 }
 0x8fb   :  { %v604_v45 = vpop.f32.mrf.mxu0 }
 0x8fc   :  { %v609_v16 = vrot.slane %v604_v45, 5  ;;  %v610_v17 = vrot.slane %v604_v45, 6 }
 0x8fd   :  { %v2574_v18 = vpop.f32.mrf.mxu0 }
 0x8fe   :  { %v613_v19 = vadd.f32 %v609_v16, %v3033_v14  ;;  %v614_v20 = vadd.f32 %v610_v17, %v3031_v10 }
 0x900   :  { %2791 = vtanh.f32 %v613_v19  ;;  %v2393_v23 = vmul.f32 -1.442695, %v613_v19  ;;  %v2394_v24 = vmul.f32 -1.442695, %v614_v20 }
 0x901   :  { %2793 = vtanh.f32 %v614_v20 }
 0x902   :  { %2795 = vpow2.f32 %v2393_v23 }
 0x903   :  { %2797 = vpow2.f32 %v2394_v24 }
 0x90d   :  { %v2792_v21 = vpop.eup %2791 }
 0x90e   :  { %v2794_v22 = vpop.eup %2793  ;;  %639 = vrot.lane.b32.xlu1 %v2792_v21, %s2962_s0 }
 0x90f   :  { %641 = vrot.lane.b32.xlu0 %v2794_v22, %s2962_s0  ;;  %v2796_v25 = vpop.eup %2795 }
 0x910   :  { %v2798_v26 = vpop.eup %2797  ;;  %v621_v27 = vadd.f32 1.0, %v2796_v25 }
 0x911   :  { %v622_v28 = vadd.f32 1.0, %v2798_v26 }
 0x912   :  { %2799 = vrcp.f32 %v621_v27 }
 0x913   :  { %2801 = vrcp.f32 %v622_v28 }
 0x91f   :  { %v2800_v29 = vpop.eup %2799 }
 0x920   :  { %v2802_v31 = vpop.eup %2801  ;;  %v635_v37 = vmul.f32 %v2800_v29, %v631_v35 }
 0x921   :  { %v636_v38 = vmul.f32 %v2802_v31, %v632_v36 }
 0x980   :  { %v640_v30 = vpop.permute.xlu1 %639 }
 0x981   :  { %v642_v32 = vpop.permute.xlu0 %641  ;;  %v645_v33 = vmul.f32 %v2800_v29, %v640_v30 }
 0x982   :  { %v646_v34 = vmul.f32 %v2802_v31, %v642_v32 }
 0x983   :  { %649 = vrot.lane.b32.xlu1 %v645_v33, %s2962_s0 }
 0x984   :  { %651 = vrot.lane.b32.xlu0 %v646_v34, %s2962_s0 }
 0x9f5   :  { %v650_v39 = vpop.permute.xlu1 %649 }
 0x9f6   :  { %v652_v40 = vpop.permute.xlu0 %651  ;;  %v3129_v41 = vadd.f32 %v650_v39, %v635_v37 }
 0x9f7   :  { %v3131_v42 = vadd.f32 %v652_v40, %v636_v38 }
 0x9f8   :  { %2803 = vtanh.f32 %v3129_v41  ;;  %v771_v20 = vrot.slane %v3129_v41, 7 }
 0x9f9   :  { %2805 = vtanh.f32 %v3131_v42  ;;  %v772_v21 = vrot.slane %v3131_v42, 7 }
 0xa05   :  { %v2804_v43 = vpop.eup %2803 }
 0xa06   :  { %v2806_v44 = vpop.eup %2805  ;;  %661 = vrot.lane.b32.xlu1 %v2804_v43, %s2962_s0 }
 0xa07   :  { %663 = vrot.lane.b32.xlu0 %v2806_v44, %s2962_s0 }
 0xa78   :  { %v662_v46 = vpop.permute.xlu1 %661 }
 0xa79   :  { %v664_v47 = vpop.permute.xlu0 %663  ;;  %v667_v48 = vmul.f32 %v2800_v29, %v662_v46 }
 0xa7a   :  { %v668_v49 = vmul.f32 %v2802_v31, %v664_v47 }
 0xa7b   :  { %v671_v50 = vrot.slane %v667_v48, 3  ;;  %v1240_v51 = vrot.slane %v667_v48, 5 }
 0xa7c   :  { %v672_v52 = vrot.slane %v668_v49, 2  ;;  %v1241_v53 = vrot.slane %v668_v49, 4 }
 0xa7e   :  { %v673_v54 = vsel %vm254_vm3, %v672_v52, %v671_v50  ;;  %v1243_v55 = vsel %vm1242_vm8, %v1241_v53, %v1240_v51 }
 0xa7f   :  { %674 = vrot.lane.b32.xlu1 %v673_v54, %s2963_s19  ;;  %v3142_v56 = vsel %vm1262_vm9, %v3108_v13, %v1243_v55 }
 0xaf1   :  { %v675_v57 = vpop.permute.xlu1 %674 }
 0xaf2   :  { %2584 = vmatmul.mubr.msk.f32.vlgmr.msra.gmra.mxu1 %vm123_vm4, %v675_v57 }
 0xaf3   :  { %2598 = vmatpush3.msra.mxu1 %v2985_v1  ;;  %2605 = vmatprep.mubr.msk.f32.mxu1 %vm2961_vm0, %v2960_v0 }
 0xaf4   :  { %2599 = vmatprep.subr.mxu1 %v2960_v0 }
 0xaf5   :  { %2600 = vmatpush3.msra.mxu1 %v2992_v4 }
 0xaf6   :  { %2601 = vmatprep.subr.mxu1 %v2960_v0 }
 0xaf7   :  { %2602 = vmatpush3.msra.mxu1 %v2999_v6 }
 0xaf8   :  { %2603 = vmatprep.subr.mxu1 %v2960_v0 }
 0xaf9   :  { %2604 = vmatpush3.msra.mxu1 %v3003_v7 }
 0xbb2   :  { %v744_v58 = vpop.f32.mrf.mxu1 }
 0xbb3   :  { %v749_v59 = vrot.slane %v744_v58, 4  ;;  %v750_v60 = vrot.slane %v744_v58, 5 }
 0xbb4   :  { %v2585_v61 = vpop.f32.mrf.mxu1 }
 0xbb5   :  { %v753_v62 = vadd.f32 %v749_v59, %v3033_v14  ;;  %v754_v63 = vadd.f32 %v750_v60, %v3031_v10 }
 0xbb7   :  { %2807 = vtanh.f32 %v753_v62  ;;  %v2396_v5 = vmul.f32 -1.442695, %v753_v62  ;;  %v2397_v8 = vmul.f32 -1.442695, %v754_v63 }
 0xbb8   :  { %2809 = vtanh.f32 %v754_v63 }
 0xbb9   :  { %2811 = vpow2.f32 %v2396_v5 }
 0xbba   :  { %2813 = vpow2.f32 %v2397_v8 }
 0xbc4   :  { %v2808_v2 = vpop.eup %2807 }
 0xbc5   :  { %v2810_v3 = vpop.eup %2809  ;;  %779 = vrot.lane.b32.xlu0 %v2808_v2, %s2962_s0 }
 0xbc6   :  { %781 = vrot.lane.b32.xlu1 %v2810_v3, %s2962_s0  ;;  %v2812_v9 = vpop.eup %2811 }
 0xbc7   :  { %v2814_v11 = vpop.eup %2813  ;;  %v761_v12 = vadd.f32 1.0, %v2812_v9 }
 0xbc8   :  { %v762_v13 = vadd.f32 1.0, %v2814_v11 }
 0xbc9   :  { %2815 = vrcp.f32 %v761_v12 }
 0xbca   :  { %2817 = vrcp.f32 %v762_v13 }
 0xbd6   :  { %v2816_v15 = vpop.eup %2815 }
 0xbd7   :  { %v2818_v16 = vpop.eup %2817  ;;  %v775_v22 = vmul.f32 %v2816_v15, %v771_v20 }
 0xbd8   :  { %v776_v23 = vmul.f32 %v2818_v16, %v772_v21 }
 0xc37   :  { %v780_v45 = vpop.permute.xlu0 %779 }
 0xc38   :  { %v782_v17 = vpop.permute.xlu1 %781  ;;  %v785_v18 = vmul.f32 %v2816_v15, %v780_v45 }
 0xc39   :  { %v786_v19 = vmul.f32 %v2818_v16, %v782_v17 }
 0xc3a   :  { %789 = vrot.lane.b32.xlu0 %v785_v18, %s2962_s0 }
 0xc3b   :  { %791 = vrot.lane.b32.xlu1 %v786_v19, %s2962_s0 }
 0xcac   :  { %v790_v24 = vpop.permute.xlu0 %789 }
 0xcad   :  { %v792_v25 = vpop.permute.xlu1 %791  ;;  %v795_v26 = vadd.f32 %v790_v24, %v775_v22 }
 0xcae   :  { %v796_v27 = vadd.f32 %v792_v25, %v776_v23 }
 0xcaf   :  { %2819 = vtanh.f32 %v795_v26  ;;  %v911_v55 = vrot.slane %v795_v26, 7 }
 0xcb0   :  { %2821 = vtanh.f32 %v796_v27  ;;  %v912_v57 = vrot.slane %v796_v27, 7 }
 0xcbc   :  { %v2820_v28 = vpop.eup %2819 }
 0xcbd   :  { %v2822_v29 = vpop.eup %2821  ;;  %801 = vrot.lane.b32.xlu0 %v2820_v28, %s2962_s0 }
 0xcbe   :  { %803 = vrot.lane.b32.xlu1 %v2822_v29, %s2962_s0 }
 0xd2f   :  { %v802_v30 = vpop.permute.xlu0 %801 }
 0xd30   :  { %v804_v31 = vpop.permute.xlu1 %803  ;;  %v807_v32 = vmul.f32 %v2816_v15, %v802_v30 }
 0xd31   :  { %v808_v33 = vmul.f32 %v2818_v16, %v804_v31 }
 0xd32   :  { %v811_v34 = vrot.slane %v807_v32, 4 }
 0xd33   :  { %v812_v35 = vrot.slane %v808_v33, 3 }
 0xd35   :  { %v3165_v36 = vsel %vm254_vm3, %v812_v35, %v811_v34 }
 0xd36   :  { %814 = vrot.lane.b32.xlu0 %v3165_v36, %s2963_s19 }
 0xda8   :  { %v815_v37 = vpop.permute.xlu0 %814 }
 0xda9   :  { %2595 = vmatmul.mubr.msk.f32.vlgmr.msra.gmra.mxu0 %vm123_vm4, %v815_v37 }
 0xdaa   :  { %2609 = vmatpush3.msra.mxu0 %v2985_v1  ;;  %2616 = vmatprep.mubr.msk.f32.mxu0 %vm2961_vm0, %v2960_v0 }
 0xdab   :  { %2610 = vmatprep.subr.mxu0 %v2960_v0 }
 0xdac   :  { %2611 = vmatpush3.msra.mxu0 %v2992_v4 }
 0xdad   :  { %2612 = vmatprep.subr.mxu0 %v2960_v0 }
 0xdae   :  { %2613 = vmatpush3.msra.mxu0 %v2999_v6 }
 0xdaf   :  { %2614 = vmatprep.subr.mxu0 %v2960_v0 }
 0xdb0   :  { %2615 = vmatpush3.msra.mxu0 %v3003_v7 }
 0xdb1   :  { %2630 = vmatprep.subr.mxu0 %v2960_v0 }
 0xe69   :  { %v884_v38 = vpop.f32.mrf.mxu0 }
 0xe6a   :  { %v889_v39 = vrot.slane %v884_v38, 3  ;;  %v890_v1 = vrot.slane %v884_v38, 4 }
 0xe6b   :  { %v2596_v40 = vpop.f32.mrf.mxu0 }
 0xe6c   :  { %v893_v41 = vadd.f32 %v889_v39, %v3033_v14  ;;  %v894_v42 = vadd.f32 %v890_v1, %v3031_v10 }
 0xe6e   :  { %2823 = vtanh.f32 %v893_v41  ;;  %v2399_v6 = vmul.f32 -1.442695, %v893_v41  ;;  %v2400_v7 = vmul.f32 -1.442695, %v894_v42 }
 0xe6f   :  { %2825 = vtanh.f32 %v894_v42 }
 0xe70   :  { %2827 = vpow2.f32 %v2399_v6 }
 0xe71   :  { %2829 = vpow2.f32 %v2400_v7 }
 0xe7b   :  { %v2824_v4 = vpop.eup %2823 }
 0xe7c   :  { %v2826_v43 = vpop.eup %2825  ;;  %919 = vrot.lane.b32.xlu1 %v2824_v4, %s2962_s0 }
 0xe7d   :  { %921 = vrot.lane.b32.xlu0 %v2826_v43, %s2962_s0  ;;  %v2828_v44 = vpop.eup %2827 }
 0xe7e   :  { %v2830_v46 = vpop.eup %2829  ;;  %v901_v47 = vadd.f32 1.0, %v2828_v44 }
 0xe7f   :  { %v902_v48 = vadd.f32 1.0, %v2830_v46 }
 0xe80   :  { %2831 = vrcp.f32 %v901_v47 }
 0xe81   :  { %2833 = vrcp.f32 %v902_v48 }
 0xe8d   :  { %v2832_v49 = vpop.eup %2831 }
 0xe8e   :  { %v2834_v51 = vpop.eup %2833  ;;  %v915_v58 = vmul.f32 %v2832_v49, %v911_v55 }
 0xe8f   :  { %v916_v59 = vmul.f32 %v2834_v51, %v912_v57 }
 0xeee   :  { %v920_v50 = vpop.permute.xlu1 %919 }
 0xeef   :  { %v922_v52 = vpop.permute.xlu0 %921  ;;  %v925_v53 = vmul.f32 %v2832_v49, %v920_v50 }
 0xef0   :  { %v926_v54 = vmul.f32 %v2834_v51, %v922_v52 }
 0xef1   :  { %929 = vrot.lane.b32.xlu1 %v925_v53, %s2962_s0 }
 0xef2   :  { %931 = vrot.lane.b32.xlu0 %v926_v54, %s2962_s0 }
 0xf63   :  { %v930_v60 = vpop.permute.xlu1 %929 }
 0xf64   :  { %v932_v61 = vpop.permute.xlu0 %931  ;;  %v935_v62 = vadd.f32 %v930_v60, %v915_v58 }
 0xf65   :  { %v936_v63 = vadd.f32 %v932_v61, %v916_v59 }
 0xf66   :  { %2835 = vtanh.f32 %v935_v62  ;;  %v1051_v1 = vrot.slane %v935_v62, 7 }
 0xf67   :  { %2837 = vtanh.f32 %v936_v63  ;;  %v1052_v40 = vrot.slane %v936_v63, 7 }
 0xf73   :  { %v2836_v2 = vpop.eup %2835 }
 0xf74   :  { %v2838_v3 = vpop.eup %2837  ;;  %941 = vrot.lane.b32.xlu1 %v2836_v2, %s2962_s0 }
 0xf75   :  { %943 = vrot.lane.b32.xlu0 %v2838_v3, %s2962_s0 }
 0xfe6   :  { %v942_v5 = vpop.permute.xlu1 %941 }
 0xfe7   :  { %v944_v8 = vpop.permute.xlu0 %943  ;;  %v947_v9 = vmul.f32 %v2832_v49, %v942_v5 }
 0xfe8   :  { %v948_v11 = vmul.f32 %v2834_v51, %v944_v8 }
 0xfe9   :  { %v951_v12 = vrot.slane %v947_v9, 5  ;;  %v1246_v13 = vrot.slane %v947_v9, 3 }
 0xfea   :  { %v952_v15 = vrot.slane %v948_v11, 4  ;;  %v1247_v45 = vrot.slane %v948_v11, 2 }
 0xfec   :  { %v1248_v16 = vsel %vm1232_vm5, %v1247_v45, %v1246_v13  ;;  %v953_v17 = vsel %vm254_vm3, %v952_v15, %v951_v12 }
 0xfed   :  { %954 = vrot.lane.b32.xlu1 %v953_v17, %s2963_s19  ;;  %v1264_v58 = vsel %vm1259_vm7, %v3165_v36, %v1248_v16 }
0x105f   :  { %v955_v18 = vpop.permute.xlu1 %954 }
0x1060   :  { %2606 = vmatmul.mubr.msk.f32.vlgmr.msra.gmra.mxu1 %vm123_vm4, %v955_v18 }
0x1120   :  { %v1024_v19 = vpop.f32.mrf.mxu1 }
0x1121   :  { %v1029_v20 = vrot.slane %v1024_v19, 2  ;;  %v1030_v21 = vrot.slane %v1024_v19, 3 }
0x1122   :  { %v2607_v22 = vpop.f32.mrf.mxu1 }
0x1123   :  { %v1033_v23 = vadd.f32 %v1029_v20, %v3033_v14  ;;  %v1034_v24 = vadd.f32 %v1030_v21, %v3031_v10 }
0x1125   :  { %2839 = vtanh.f32 %v1033_v23  ;;  %v2402_v27 = vmul.f32 -1.442695, %v1033_v23  ;;  %v2403_v28 = vmul.f32 -1.442695, %v1034_v24 }
0x1126   :  { %2841 = vtanh.f32 %v1034_v24 }
0x1127   :  { %2843 = vpow2.f32 %v2402_v27 }
0x1128   :  { %2845 = vpow2.f32 %v2403_v28  ;;  %v1270_v28 = vld [vmem:[#allocation2 + $0x48] sm:$0xff] }
0x1129   :  { %2619 = vmatprep.subr.mxu1 %v1270_v28 }
0x112a   :  { %2620 = vmatpush3.msra.mxu1 %v1270_v28 }
0x1132   :  { %v2840_v25 = vpop.eup %2839 }
0x1133   :  { %v2842_v26 = vpop.eup %2841  ;;  %1059 = vrot.lane.b32.xlu0 %v2840_v25, %s2962_s0 }
0x1134   :  { %1061 = vrot.lane.b32.xlu1 %v2842_v26, %s2962_s0  ;;  %v2844_v29 = vpop.eup %2843 }
0x1135   :  { %v2846_v30 = vpop.eup %2845  ;;  %v1041_v31 = vadd.f32 1.0, %v2844_v29  ;;  %v1269_v29 = vld [vmem:[#allocation2 + $0x40] sm:$0xff] }
0x1136   :  { %v1042_v32 = vadd.f32 1.0, %v2846_v30  ;;  %v3217_v30 = vld [vmem:[#allocation2 + $0x68] sm:$0xff]  ;;  %2621 = vmatprep.subr.mxu1 %v1269_v29 }
0x1137   :  { %2847 = vrcp.f32 %v1041_v31  ;;  %v3220_v31 = vld [vmem:[#allocation2 + $0x60] sm:$0xff]  ;;  %2622 = vmatpush3.msra.mxu1 %v1269_v29 }
0x1138   :  { %2849 = vrcp.f32 %v1042_v32  ;;  %v1268_v32 = vld [vmem:[#allocation2 + $0x38] sm:$0xff] }
0x1139   :  { %2623 = vmatprep.subr.mxu1 %v1268_v32 }
0x113a   :  { %2624 = vmatpush3.msra.mxu1 %v1268_v32 }
0x1144   :  { %v2848_v33 = vpop.eup %2847 }
0x1145   :  { %v2850_v35 = vpop.eup %2849  ;;  %v1055_v41 = vmul.f32 %v2848_v33, %v1051_v1 }
0x1146   :  { %v1056_v42 = vmul.f32 %v2850_v35, %v1052_v40 }
0x11a5   :  { %v1060_v34 = vpop.permute.xlu0 %1059 }
0x11a6   :  { %v1062_v37 = vpop.permute.xlu1 %1061  ;;  %v1065_v38 = vmul.f32 %v2848_v33, %v1060_v34  ;;  %v1267_v34 = vld [vmem:[#allocation2 + $0x30] sm:$0xff] }
0x11a7   :  { %v1066_v39 = vmul.f32 %v2850_v35, %v1062_v37  ;;  %2625 = vmatprep.subr.mxu1 %v1267_v34 }
0x11a8   :  { %1069 = vrot.lane.b32.xlu0 %v1065_v38, %s2962_s0  ;;  %2626 = vmatpush3.msra.mxu1 %v1267_v34  ;;  %v3234_v38 = vld [vmem:[#allocation2 + $0x50] sm:$0xff] }
0x11a9   :  { %1071 = vrot.lane.b32.xlu1 %v1066_v39, %s2962_s0  ;;  %2641 = vmatprep.subr.mxu1 %v2960_v0 }
0x121a   :  { %v1070_v4 = vpop.permute.xlu0 %1069 }
0x121b   :  { %v1072_v43 = vpop.permute.xlu1 %1071  ;;  %v1075_v6 = vadd.f32 %v1070_v4, %v1055_v41 }
0x121c   :  { %v1076_v7 = vadd.f32 %v1072_v43, %v1056_v42 }
0x121d   :  { %2851 = vtanh.f32 %v1075_v6  ;;  %v1191_v20 = vrot.slane %v1075_v6, 7 }
0x121e   :  { %2853 = vtanh.f32 %v1076_v7  ;;  %v1192_v21 = vrot.slane %v1076_v7, 7 }
0x122a   :  { %v2852_v44 = vpop.eup %2851 }
0x122b   :  { %v2854_v46 = vpop.eup %2853  ;;  %1081 = vrot.lane.b32.xlu0 %v2852_v44, %s2962_s0 }
0x122c   :  { %1083 = vrot.lane.b32.xlu1 %v2854_v46, %s2962_s0  ;;  %v2407_v46 = vld [vmem:[#allocation2 + $0x70] ss:$0 sm:$0xff] }
0x129d   :  { %v1082_v47 = vpop.permute.xlu0 %1081 }
0x129e   :  { %v1084_v48 = vpop.permute.xlu1 %1083  ;;  %v1087_v49 = vmul.f32 %v2848_v33, %v1082_v47  ;;  %v3223_v33 = vld [vmem:[#allocation2 + $0x58] sm:$0xff] }
0x129f   :  { %v1088_v50 = vmul.f32 %v2850_v35, %v1084_v48 }
0x12a0   :  { %v1091_v51 = vrot.slane %v1087_v49, 6  ;;  %v1250_v52 = vrot.slane %v1087_v49, 2 }
0x12a1   :  { %v1092_v53 = vrot.slane %v1088_v50, 5  ;;  %v1251_v54 = vrot.slane %v1088_v50, 1 }
0x12a3   :  { %v1093_v55 = vsel %vm254_vm3, %v1092_v53, %v1091_v51  ;;  %v1252_v57 = vsel %vm1237_vm6, %v1251_v54, %v1250_v52 }
0x12a4   :  { %1094 = vrot.lane.b32.xlu0 %v1093_v55, %s2963_s19  ;;  %v3206_v59 = vsel %vm44_vm1, %v1264_v58, %v1252_v57 }
0x1316   :  { %v1095_v60 = vpop.permute.xlu0 %1094 }
0x1317   :  { %2617 = vmatmul.mubr.msk.f32.vlgmr.msra.gmra.mxu0 %vm123_vm4, %v1095_v60 }
0x1318   :  { %2638 = vmatprep.mubr.msk.f32.mxu0 %vm2961_vm0, %v2960_v0  ;;  %2631 = vmatpush3.msra.mxu0 %v3217_v30 }
0x1319   :  { %2632 = vmatprep.subr.mxu0 %v2960_v0 }
0x131a   :  { %2633 = vmatpush3.msra.mxu0 %v3220_v31 }
0x131b   :  { %2634 = vmatprep.subr.mxu0 %v2960_v0 }
0x131c   :  { %2635 = vmatpush3.msra.mxu0 %v3223_v33 }
0x131d   :  { %2636 = vmatprep.subr.mxu0 %v2960_v0 }
0x131e   :  { %2637 = vmatpush3.msra.mxu0 %v3234_v38 }
0x131f   :  { %2639 = vmatmul.mubr.f32.vlgmr.msra.gmra.mxu0 %v2960_v0  ;;  %2652 = vmatprep.subr.mxu0 %v2960_v0 }
0x1320   :  { %2653 = vmatpush3.msra.mxu0 %v3217_v30  ;;  %2660 = vmatprep.mubr.msk.f32.mxu0 %vm2961_vm0, %v2960_v0 }
0x1321   :  { %2654 = vmatprep.subr.mxu0 %v2960_v0 }
0x1322   :  { %2655 = vmatpush3.msra.mxu0 %v3220_v31 }
0x1323   :  { %2656 = vmatprep.subr.mxu0 %v2960_v0 }
0x1324   :  { %2657 = vmatpush3.msra.mxu0 %v3223_v33 }
0x1325   :  { %2658 = vmatprep.subr.mxu0 %v2960_v0 }
0x1326   :  { %2659 = vmatpush3.msra.mxu0 %v3234_v38 }
0x1327   :  { %2674 = vmatprep.subr.mxu0 %v2960_v0 }
0x13d7   :  { %v1164_v61 = vpop.f32.mrf.mxu0 }
0x13d8   :  { %v1169_v62 = vrot.slane %v1164_v61, 1  ;;  %v1170_v63 = vrot.slane %v1164_v61, 2 }
0x13d9   :  { %v2618_v2 = vpop.f32.mrf.mxu0 }
0x13da   :  { %v1173_v3 = vadd.f32 %v1169_v62, %v3033_v14  ;;  %v1174_v5 = vadd.f32 %v1170_v63, %v3031_v10 }
0x13dc   :  { %2855 = vtanh.f32 %v1173_v3  ;;  %v2405_v9 = vmul.f32 -1.442695, %v1173_v3  ;;  %v2406_v11 = vmul.f32 -1.442695, %v1174_v5 }
0x13dd   :  { %2857 = vtanh.f32 %v1174_v5 }
0x13de   :  { %2859 = vpow2.f32 %v2405_v9 }
0x13df   :  { %2861 = vpow2.f32 %v2406_v11  ;;  %v1431_v7 = vpop.f32.mrf.mxu0 }
0x13e1   :  { %v2640_v44 = vpop.f32.mrf.mxu0 }
0x13e9   :  { %v2856_v36 = vpop.eup %2855 }
0x13ea   :  { %v2858_v8 = vpop.eup %2857  ;;  %1199 = vrot.lane.b32.xlu1 %v2856_v36, %s2962_s0 }
0x13eb   :  { %1201 = vrot.lane.b32.xlu0 %v2858_v8, %s2962_s0  ;;  %v2860_v12 = vpop.eup %2859 }
0x13ec   :  { %v2862_v13 = vpop.eup %2861  ;;  %v1181_v15 = vadd.f32 1.0, %v2860_v12 }
0x13ed   :  { %v1182_v45 = vadd.f32 1.0, %v2862_v13 }
0x13ee   :  { %2863 = vrcp.f32 %v1181_v15 }
0x13ef   :  { %2865 = vrcp.f32 %v1182_v45 }
0x13fb   :  { %v2864_v14 = vpop.eup %2863 }
0x13fc   :  { %v2866_v16 = vpop.eup %2865  ;;  %v1195_v22 = vmul.f32 %v2864_v14, %v1191_v20 }
0x13fd   :  { %v1196_v23 = vmul.f32 %v2866_v16, %v1192_v21 }
0x145c   :  { %v1200_v10 = vpop.permute.xlu1 %1199 }
0x145d   :  { %v1202_v17 = vpop.permute.xlu0 %1201  ;;  %v1205_v18 = vmul.f32 %v2864_v14, %v1200_v10 }
0x145e   :  { %v1206_v19 = vmul.f32 %v2866_v16, %v1202_v17 }
0x145f   :  { %1209 = vrot.lane.b32.xlu1 %v1205_v18, %s2962_s0 }
0x1460   :  { %1211 = vrot.lane.b32.xlu0 %v1206_v19, %s2962_s0 }
0x14d1   :  { %v1210_v24 = vpop.permute.xlu1 %1209 }
0x14d2   :  { %v1212_v25 = vpop.permute.xlu0 %1211  ;;  %v1215_v26 = vadd.f32 %v1210_v24, %v1195_v22 }
0x14d3   :  { %v1216_v27 = vadd.f32 %v1212_v25, %v1196_v23 }
0x14d4   :  { %2867 = vtanh.f32 %v1215_v26 }
0x14d5   :  { %2869 = vtanh.f32 %v1216_v27 }
0x14e1   :  { %v2868_v35 = vpop.eup %2867 }
0x14e2   :  { %v2870_v37 = vpop.eup %2869  ;;  %1221 = vrot.lane.b32.xlu1 %v2868_v35, %s2962_s0 }
0x14e3   :  { %1223 = vrot.lane.b32.xlu0 %v2870_v37, %s2962_s0 }
0x14e6   :  { %1282 = vrot.lane.b32.xlu1 %v3142_v56, %s2963_s19 }
0x1554   :  { %v1222_v39 = vpop.permute.xlu1 %1221 }
0x1555   :  { %v1224_v56 = vpop.permute.xlu0 %1223  ;;  %v1227_v1 = vmul.f32 %v2864_v14, %v1222_v39 }
0x1556   :  { %v1228_v40 = vmul.f32 %v2866_v16, %v1224_v56 }
0x1557   :  { %v1256_v41 = vrot.slane %v1227_v1, 1 }
0x1558   :  { %v1283_v42 = vpop.permute.xlu1 %1282 }
0x1559   :  { %2627 = vmatprep.mubr.msk.f32.mxu1 %vm123_vm4, %v1283_v42  ;;  %v1257_v4 = vsel %vm1242_vm8, %v1228_v40, %v1256_v41 }
0x155a   :  { %v1266_v43 = vsel %vm1262_vm9, %v3206_v59, %v1257_v4 }
0x155b   :  { %1284 = vrot.lane.b32.xlu0 %v1266_v43, %s2963_s19 }
0x15cd   :  { %v1285_v6 = vpop.permute.xlu0 %1284 }
0x15ce   :  { %2628 = vmatmul.mubr.msk.f32.vlgmr.msra.gmra.mxu1 %vm123_vm4, %v1285_v6 }
0x15cf   :  { %2642 = vmatpush3.msra.mxu1 %v3217_v30  ;;  %2649 = vmatprep.mubr.msk.f32.mxu1 %vm2961_vm0, %v2960_v0 }
0x15d0   :  { %2643 = vmatprep.subr.mxu1 %v2960_v0 }
0x15d1   :  { %2644 = vmatpush3.msra.mxu1 %v3220_v31 }
0x15d2   :  { %2645 = vmatprep.subr.mxu1 %v2960_v0 }
0x15d3   :  { %2646 = vmatpush3.msra.mxu1 %v3223_v33 }
0x15d4   :  { %2647 = vmatprep.subr.mxu1 %v2960_v0 }
0x15d5   :  { %2648 = vmatpush3.msra.mxu1 %v3234_v38 }
0x15d6   :  { %2663 = vmatprep.subr.mxu1 %v2960_v0 }
0x168e   :  { %v2629_v47 = vpop.f32.mrf.mxu1 }
0x168f   :  { %v3265_v48 = vadd.f32 %v2629_v47, %v2407_v46 }
0x1690   :  { %v1356_v49 = vpop.f32.mrf.mxu1 }
0x1691   :  { %v3267_v50 = vadd.f32 %v2407_v46, %v1356_v49 }
0x1693   :  { %v1435_v51 = vadd.f32 %v1431_v7, %v3267_v50 }
0x1695   :  { %2871 = vtanh.f32 %v1435_v51  ;;  %v2410_v53 = vmul.f32 -1.442695, %v1435_v51 }
0x1697   :  { %2873 = vpow2.f32 %v2410_v53 }
0x16a2   :  { %v2872_v52 = vpop.eup %2871 }
0x16a3   :  { %1445 = vrot.lane.b32.xlu1 %v2872_v52, %s2962_s0 }
0x16a4   :  { %v2874_v54 = vpop.eup %2873 }
0x16a5   :  { %v1439_v55 = vadd.f32 1.0, %v2874_v54 }
0x16a7   :  { %2875 = vrcp.f32 %v1439_v55 }
0x16b4   :  { %v2876_v57 = vpop.eup %2875 }
0x16b5   :  { %v1443_v60 = vmul.f32 0.0, %v2876_v57 }
0x1715   :  { %v1446_v58 = vpop.permute.xlu1 %1445 }
0x1716   :  { %v1448_v59 = vmul.f32 %v2876_v57, %v1446_v58 }
0x1718   :  { %1450 = vrot.lane.b32.xlu0 %v1448_v59, %s2962_s0 }
0x178a   :  { %v1451_v61 = vpop.permute.xlu0 %1450 }
0x178b   :  { %v1453_v62 = vadd.f32 %v1451_v61, %v1443_v60 }
0x178d   :  { %2877 = vtanh.f32 %v1453_v62  ;;  %v1547_v17 = vrot.slane %v1453_v62, 6 }
0x179a   :  { %v2878_v63 = vpop.eup %2877 }
0x179b   :  { %1456 = vrot.lane.b32.xlu1 %v2878_v63, %s2962_s0 }
0x180d   :  { %v1457_v2 = vpop.permute.xlu1 %1456 }
0x180e   :  { %v1459_v3 = vmul.f32 %v2876_v57, %v1457_v2 }
0x1810   :  { %1461 = vrot.lane.b32.xlu0 %v1459_v3, %s2963_s19 }
0x1882   :  { %v1462_v5 = vpop.permute.xlu0 %1461 }
0x1883   :  { %2650 = vmatmul.mubr.msk.f32.vlgmr.msra.gmra.mxu1 %vm123_vm4, %v1462_v5 }
0x1884   :  { %2664 = vmatpush3.msra.mxu1 %v3217_v30  ;;  %2671 = vmatprep.mubr.msk.f32.mxu1 %vm2961_vm0, %v2960_v0 }
0x1885   :  { %2665 = vmatprep.subr.mxu1 %v2960_v0 }
0x1886   :  { %2666 = vmatpush3.msra.mxu1 %v3220_v31 }
0x1887   :  { %2667 = vmatprep.subr.mxu1 %v2960_v0 }
0x1888   :  { %2668 = vmatpush3.msra.mxu1 %v3223_v33 }
0x1889   :  { %2669 = vmatprep.subr.mxu1 %v2960_v0 }
0x188a   :  { %2670 = vmatpush3.msra.mxu1 %v3234_v38 }
0x188b   :  { %2685 = vmatprep.subr.mxu1 %v2960_v0 }
0x1943   :  { %v1531_v36 = vpop.f32.mrf.mxu1 }
0x1944   :  { %v1536_v8 = vrot.slane %v1531_v36, 6 }
0x1945   :  { %v2651_v9 = vpop.f32.mrf.mxu1 }
0x1946   :  { %v1538_v11 = vadd.f32 %v1536_v8, %v3267_v50 }
0x1948   :  { %2879 = vtanh.f32 %v1538_v11  ;;  %v2412_v13 = vmul.f32 -1.442695, %v1538_v11 }
0x194a   :  { %2881 = vpow2.f32 %v2412_v13 }
0x1955   :  { %v2880_v12 = vpop.eup %2879 }
0x1956   :  { %1551 = vrot.lane.b32.xlu1 %v2880_v12, %s2962_s0 }
0x1957   :  { %v2882_v15 = vpop.eup %2881 }
0x1958   :  { %v1542_v45 = vadd.f32 1.0, %v2882_v15 }
0x195a   :  { %2883 = vrcp.f32 %v1542_v45 }
0x1967   :  { %v2884_v14 = vpop.eup %2883 }
0x1968   :  { %v1549_v18 = vmul.f32 %v2884_v14, %v1547_v17 }
0x19c8   :  { %v1552_v10 = vpop.permute.xlu1 %1551 }
0x19c9   :  { %v1554_v16 = vmul.f32 %v2884_v14, %v1552_v10 }
0x19cb   :  { %1556 = vrot.lane.b32.xlu0 %v1554_v16, %s2962_s0 }
0x1a3d   :  { %v1557_v19 = vpop.permute.xlu0 %1556 }
0x1a3e   :  { %v1559_v20 = vadd.f32 %v1557_v19, %v1549_v18 }
0x1a40   :  { %2885 = vtanh.f32 %v1559_v20  ;;  %v1654_v40 = vrot.slane %v1559_v20, 6 }
0x1a4d   :  { %v2886_v21 = vpop.eup %2885 }
0x1a4e   :  { %1562 = vrot.lane.b32.xlu1 %v2886_v21, %s2962_s0 }
0x1ac0   :  { %v1563_v22 = vpop.permute.xlu1 %1562 }
0x1ac1   :  { %v1565_v23 = vmul.f32 %v2884_v14, %v1563_v22 }
0x1ac3   :  { %v1567_v24 = vrot.slane %v1565_v23, 2 }
0x1ac5   :  { %1568 = vrot.lane.b32.xlu0 %v1567_v24, %s2963_s19 }
0x1b37   :  { %v1569_v25 = vpop.permute.xlu0 %1568 }
0x1b38   :  { %2661 = vmatmul.mubr.msk.f32.vlgmr.msra.gmra.mxu0 %vm123_vm4, %v1569_v25 }
0x1b39   :  { %2675 = vmatpush3.msra.mxu0 %v3217_v30  ;;  %2682 = vmatprep.mubr.msk.f32.mxu0 %vm2961_vm0, %v2960_v0 }
0x1b3a   :  { %2676 = vmatprep.subr.mxu0 %v2960_v0 }
0x1b3b   :  { %2677 = vmatpush3.msra.mxu0 %v3220_v31 }
0x1b3c   :  { %2678 = vmatprep.subr.mxu0 %v2960_v0 }
0x1b3d   :  { %2679 = vmatpush3.msra.mxu0 %v3223_v33 }
0x1b3e   :  { %2680 = vmatprep.subr.mxu0 %v2960_v0 }
0x1b3f   :  { %2681 = vmatpush3.msra.mxu0 %v3234_v38 }
0x1b40   :  { %2696 = vmatprep.subr.mxu0 %v2960_v0 }
0x1bf8   :  { %v1638_v26 = vpop.f32.mrf.mxu0 }
0x1bf9   :  { %v1643_v27 = vrot.slane %v1638_v26, 4 }
0x1bfa   :  { %v2662_v28 = vpop.f32.mrf.mxu0 }
0x1bfb   :  { %v1645_v29 = vadd.f32 %v1643_v27, %v3267_v50 }
0x1bfd   :  { %2887 = vtanh.f32 %v1645_v29  ;;  %v2414_v34 = vmul.f32 -1.442695, %v1645_v29 }
0x1bff   :  { %2889 = vpow2.f32 %v2414_v34 }
0x1c0a   :  { %v2888_v32 = vpop.eup %2887 }
0x1c0b   :  { %1658 = vrot.lane.b32.xlu1 %v2888_v32, %s2962_s0 }
0x1c0c   :  { %v2890_v35 = vpop.eup %2889 }
0x1c0d   :  { %v1649_v37 = vadd.f32 1.0, %v2890_v35 }
0x1c0f   :  { %2891 = vrcp.f32 %v1649_v37 }
0x1c1c   :  { %v2892_v39 = vpop.eup %2891 }
0x1c1d   :  { %v1656_v41 = vmul.f32 %v2892_v39, %v1654_v40 }
0x1c7d   :  { %v1659_v56 = vpop.permute.xlu1 %1658 }
0x1c7e   :  { %v1661_v1 = vmul.f32 %v2892_v39, %v1659_v56 }
0x1c80   :  { %1663 = vrot.lane.b32.xlu0 %v1661_v1, %s2962_s0 }
0x1cf2   :  { %v1664_v42 = vpop.permute.xlu0 %1663 }
0x1cf3   :  { %v1666_v4 = vadd.f32 %v1664_v42, %v1656_v41 }
0x1cf5   :  { %2893 = vtanh.f32 %v1666_v4  ;;  %v1761_v61 = vrot.slane %v1666_v4, 6 }
0x1d02   :  { %v2894_v43 = vpop.eup %2893 }
0x1d03   :  { %1669 = vrot.lane.b32.xlu1 %v2894_v43, %s2962_s0 }
0x1d75   :  { %v1670_v6 = vpop.permute.xlu1 %1669 }
0x1d76   :  { %v1672_v7 = vmul.f32 %v2892_v39, %v1670_v6 }
0x1d78   :  { %v1674_v44 = vrot.slane %v1672_v7, 4 }
0x1d7a   :  { %1675 = vrot.lane.b32.xlu0 %v1674_v44, %s2963_s19 }
0x1dec   :  { %v1676_v46 = vpop.permute.xlu0 %1675 }
0x1ded   :  { %2672 = vmatmul.mubr.msk.f32.vlgmr.msra.gmra.mxu1 %vm123_vm4, %v1676_v46 }
0x1dee   :  { %2686 = vmatpush3.msra.mxu1 %v3217_v30  ;;  %2693 = vmatprep.mubr.msk.f32.mxu1 %vm2961_vm0, %v2960_v0 }
0x1def   :  { %2687 = vmatprep.subr.mxu1 %v2960_v0 }
0x1df0   :  { %2688 = vmatpush3.msra.mxu1 %v3220_v31 }
0x1df1   :  { %2689 = vmatprep.subr.mxu1 %v2960_v0 }
0x1df2   :  { %2690 = vmatpush3.msra.mxu1 %v3223_v33 }
0x1df3   :  { %2691 = vmatprep.subr.mxu1 %v2960_v0 }
0x1df4   :  { %2692 = vmatpush3.msra.mxu1 %v3234_v38 }
0x1df5   :  { %2707 = vmatprep.subr.mxu1 %v2960_v0 }
0x1ead   :  { %v1745_v47 = vpop.f32.mrf.mxu1 }
0x1eae   :  { %v1750_v49 = vrot.slane %v1745_v47, 2 }
0x1eaf   :  { %v2673_v51 = vpop.f32.mrf.mxu1 }
0x1eb0   :  { %v1752_v52 = vadd.f32 %v1750_v49, %v3267_v50 }
0x1eb2   :  { %2895 = vtanh.f32 %v1752_v52  ;;  %v2416_v54 = vmul.f32 -1.442695, %v1752_v52 }
0x1eb4   :  { %2897 = vpow2.f32 %v2416_v54 }
0x1ebf   :  { %v2896_v53 = vpop.eup %2895 }
0x1ec0   :  { %1765 = vrot.lane.b32.xlu1 %v2896_v53, %s2962_s0 }
0x1ec1   :  { %v2898_v55 = vpop.eup %2897 }
0x1ec2   :  { %v1756_v57 = vadd.f32 1.0, %v2898_v55 }
0x1ec4   :  { %2899 = vrcp.f32 %v1756_v57 }
0x1ed1   :  { %v2900_v58 = vpop.eup %2899 }
0x1ed2   :  { %v1763_v62 = vmul.f32 %v2900_v58, %v1761_v61 }
0x1f32   :  { %v1766_v59 = vpop.permute.xlu1 %1765 }
0x1f33   :  { %v1768_v60 = vmul.f32 %v2900_v58, %v1766_v59 }
0x1f35   :  { %1770 = vrot.lane.b32.xlu0 %v1768_v60, %s2962_s0 }
0x1fa7   :  { %v1771_v63 = vpop.permute.xlu0 %1770 }
0x1fa8   :  { %v1773_v2 = vadd.f32 %v1771_v63, %v1763_v62 }
0x1faa   :  { %2901 = vtanh.f32 %v1773_v2  ;;  %v1865_v18 = vrot.slane %v1773_v2, 6 }
0x1fb7   :  { %v2902_v50 = vpop.eup %2901 }
0x1fb8   :  { %1776 = vrot.lane.b32.xlu1 %v2902_v50, %s2962_s0 }
0x202a   :  { %v1777_v3 = vpop.permute.xlu1 %1776 }
0x202b   :  { %v1779_v5 = vmul.f32 %v2900_v58, %v1777_v3 }
0x202d   :  { %v1781_v36 = vrot.slane %v1779_v5, 6 }
0x202f   :  { %1782 = vrot.lane.b32.xlu0 %v1781_v36, %s2963_s19 }
0x20a1   :  { %v1783_v8 = vpop.permute.xlu0 %1782 }
0x20a2   :  { %2683 = vmatmul.mubr.msk.f32.vlgmr.msra.gmra.mxu0 %vm123_vm4, %v1783_v8 }
0x20a3   :  { %2697 = vmatpush3.msra.mxu0 %v3217_v30  ;;  %2704 = vmatprep.mubr.msk.f32.mxu0 %vm2961_vm0, %v2960_v0 }
0x20a4   :  { %2698 = vmatprep.subr.mxu0 %v2960_v0 }
0x20a5   :  { %2699 = vmatpush3.msra.mxu0 %v3220_v31 }
0x20a6   :  { %2700 = vmatprep.subr.mxu0 %v2960_v0 }
0x20a7   :  { %2701 = vmatpush3.msra.mxu0 %v3223_v33 }
0x20a8   :  { %2702 = vmatprep.subr.mxu0 %v2960_v0 }
0x20a9   :  { %2703 = vmatpush3.msra.mxu0 %v3234_v38 }
0x20aa   :  { %2718 = vmatprep.subr.mxu0 %v2960_v0 }
0x2162   :  { %v1852_v9 = vpop.f32.mrf.mxu0 }
0x2163   :  { %v1856_v11 = vadd.f32 %v1852_v9, %v3265_v48 }
0x2164   :  { %v2684_v12 = vpop.f32.mrf.mxu0 }
0x2165   :  { %2903 = vtanh.f32 %v1856_v11  ;;  %v2418_v15 = vmul.f32 -1.442695, %v1856_v11 }
0x2167   :  { %2905 = vpow2.f32 %v2418_v15 }
0x2172   :  { %v2904_v13 = vpop.eup %2903 }
0x2173   :  { %1869 = vrot.lane.b32.xlu1 %v2904_v13, %s2962_s0 }
0x2174   :  { %v2906_v45 = vpop.eup %2905 }
0x2175   :  { %v1860_v14 = vadd.f32 1.0, %v2906_v45 }
0x2177   :  { %2907 = vrcp.f32 %v1860_v14 }
0x2184   :  { %v2908_v10 = vpop.eup %2907 }
0x2185   :  { %v1867_v19 = vmul.f32 %v2908_v10, %v1865_v18 }
0x21e5   :  { %v1870_v16 = vpop.permute.xlu1 %1869 }
0x21e6   :  { %v1872_v17 = vmul.f32 %v2908_v10, %v1870_v16 }
0x21e8   :  { %1874 = vrot.lane.b32.xlu0 %v1872_v17, %s2962_s0 }
0x225a   :  { %v1875_v20 = vpop.permute.xlu0 %1874 }
0x225b   :  { %v1877_v21 = vadd.f32 %v1875_v20, %v1867_v19  ;;  %v2206_v19 = vld [vmem:[#allocation2 + $0x88] sm:$0xff]  ;;  %v2205_v20 = vld [vmem:[#allocation2 + $0x80] sm:$0xff] }
0x225d   :  { %2909 = vtanh.f32 %v1877_v21 }
0x226a   :  { %v2910_v22 = vpop.eup %2909 }
0x226b   :  { %1880 = vrot.lane.b32.xlu1 %v2910_v22, %s2962_s0 }
0x22dd   :  { %v1881_v23 = vpop.permute.xlu1 %1880 }
0x22de   :  { %v1883_v24 = vmul.f32 %v2908_v10, %v1881_v23 }
0x22e0   :  { %1885 = vrot.lane.b32.xlu0 %v1883_v24, %s2963_s19 }
0x2352   :  { %v1886_v25 = vpop.permute.xlu0 %1885 }
0x2353   :  { %2694 = vmatmul.mubr.msk.f32.vlgmr.msra.gmra.mxu1 %vm123_vm4, %v1886_v25 }
0x2354   :  { %2708 = vmatpush3.msra.mxu1 %v3217_v30  ;;  %2715 = vmatprep.mubr.msk.f32.mxu1 %vm2961_vm0, %v2960_v0 }
0x2355   :  { %2709 = vmatprep.subr.mxu1 %v2960_v0 }
0x2356   :  { %2710 = vmatpush3.msra.mxu1 %v3220_v31 }
0x2357   :  { %2711 = vmatprep.subr.mxu1 %v2960_v0 }
0x2358   :  { %2712 = vmatpush3.msra.mxu1 %v3223_v33 }
0x2359   :  { %2713 = vmatprep.subr.mxu1 %v2960_v0 }
0x235a   :  { %2714 = vmatpush3.msra.mxu1 %v3234_v38  ;;  %v1971_v38 = vrot.slane %v1877_v21, 6  ;;  %v2204_v21 = vld [vmem:[#allocation2 + $0x78] sm:$0xff] }
0x235b   :  { %2729 = vmatprep.subr.mxu1 %v2960_v0 }
0x2413   :  { %v1955_v26 = vpop.f32.mrf.mxu1 }
0x2414   :  { %v1960_v27 = vrot.slane %v1955_v26, 6 }
0x2415   :  { %v2695_v30 = vpop.f32.mrf.mxu1 }
0x2416   :  { %v1962_v28 = vadd.f32 %v1960_v27, %v3265_v48  ;;  %v2210_v27 = vld [vmem:[#allocation2 + $0xa8] sm:$0xff]  ;;  %v2209_v30 = vld [vmem:[#allocation2 + $0xa0] sm:$0xff] }
0x2418   :  { %2911 = vtanh.f32 %v1962_v28  ;;  %v2420_v31 = vmul.f32 -1.442695, %v1962_v28  ;;  %v2425_v28 = vld [vmem:[#allocation2 + $0x98] ss:$0 sm:$0xff] }
0x241a   :  { %2913 = vpow2.f32 %v2420_v31 }
0x2425   :  { %v2912_v29 = vpop.eup %2911 }
0x2426   :  { %1975 = vrot.lane.b32.xlu1 %v2912_v29, %s2962_s0 }
0x2427   :  { %v2914_v32 = vpop.eup %2913 }
0x2428   :  { %v1966_v34 = vadd.f32 1.0, %v2914_v32 }
0x242a   :  { %2915 = vrcp.f32 %v1966_v34 }
0x2437   :  { %v2916_v33 = vpop.eup %2915 }
0x2438   :  { %v1973_v39 = vmul.f32 %v2916_v33, %v1971_v38 }
0x2498   :  { %v1976_v35 = vpop.permute.xlu1 %1975 }
0x2499   :  { %v1978_v37 = vmul.f32 %v2916_v33, %v1976_v35  ;;  %v2427_v35 = vld [vmem:[#allocation2 + $0xb0] ss:$0 sm:$0xff] }
0x249b   :  { %1980 = vrot.lane.b32.xlu0 %v1978_v37, %s2962_s0 }
0x250d   :  { %v1981_v56 = vpop.permute.xlu0 %1980 }
0x250e   :  { %v1983_v1 = vadd.f32 %v1981_v56, %v1973_v39 }
0x2510   :  { %2917 = vtanh.f32 %v1983_v1  ;;  %v2078_v57 = vrot.slane %v1983_v1, 6 }
0x251d   :  { %v2918_v40 = vpop.eup %2917 }
0x251e   :  { %1986 = vrot.lane.b32.xlu1 %v2918_v40, %s2962_s0 }
0x2590   :  { %v1987_v41 = vpop.permute.xlu1 %1986 }
0x2591   :  { %v1989_v42 = vmul.f32 %v2916_v33, %v1987_v41 }
0x2593   :  { %v1991_v4 = vrot.slane %v1989_v42, 2 }
0x2595   :  { %1992 = vrot.lane.b32.xlu0 %v1991_v4, %s2963_s19 }
0x2607   :  { %v1993_v43 = vpop.permute.xlu0 %1992 }
0x2608   :  { %2705 = vmatmul.mubr.msk.f32.vlgmr.msra.gmra.mxu0 %vm123_vm4, %v1993_v43 }
0x2609   :  { %2726 = vmatprep.mubr.msk.f32.mxu0 %vm2961_vm0, %v2960_v0 }
0x26c8   :  { %v2062_v6 = vpop.f32.mrf.mxu0 }
0x26c9   :  { %v2067_v7 = vrot.slane %v2062_v6, 4 }
0x26ca   :  { %v2706_v44 = vpop.f32.mrf.mxu0 }
0x26cb   :  { %v2069_v46 = vadd.f32 %v2067_v7, %v3265_v48 }
0x26cd   :  { %2919 = vtanh.f32 %v2069_v46  ;;  %v2422_v49 = vmul.f32 -1.442695, %v2069_v46 }
0x26cf   :  { %2921 = vpow2.f32 %v2422_v49 }
0x26da   :  { %v2920_v47 = vpop.eup %2919 }
0x26db   :  { %2082 = vrot.lane.b32.xlu1 %v2920_v47, %s2962_s0 }
0x26dc   :  { %v2922_v51 = vpop.eup %2921 }
0x26dd   :  { %v2073_v52 = vadd.f32 1.0, %v2922_v51 }
0x26df   :  { %2923 = vrcp.f32 %v2073_v52 }
0x26ec   :  { %v2924_v53 = vpop.eup %2923 }
0x26ed   :  { %v2080_v58 = vmul.f32 %v2924_v53, %v2078_v57 }
0x274d   :  { %v2083_v54 = vpop.permute.xlu1 %2082 }
0x274e   :  { %v2085_v55 = vmul.f32 %v2924_v53, %v2083_v54 }
0x2750   :  { %2087 = vrot.lane.b32.xlu0 %v2085_v55, %s2962_s0 }
0x27c2   :  { %v2088_v59 = vpop.permute.xlu0 %2087 }
0x27c3   :  { %v2090_v60 = vadd.f32 %v2088_v59, %v2080_v58 }
0x27c5   :  { %2925 = vtanh.f32 %v2090_v60  ;;  %v2185_v10 = vrot.slane %v2090_v60, 6 }
0x27d2   :  { %v2926_v61 = vpop.eup %2925 }
0x27d3   :  { %2093 = vrot.lane.b32.xlu1 %v2926_v61, %s2962_s0 }
0x2845   :  { %v2094_v62 = vpop.permute.xlu1 %2093 }
0x2846   :  { %v2096_v63 = vmul.f32 %v2924_v53, %v2094_v62 }
0x2848   :  { %v2098_v2 = vrot.slane %v2096_v63, 4 }
0x284a   :  { %2099 = vrot.lane.b32.xlu0 %v2098_v2, %s2963_s19 }
0x28bc   :  { %v2100_v50 = vpop.permute.xlu0 %2099 }
0x28bd   :  { %2716 = vmatmul.mubr.msk.f32.vlgmr.msra.gmra.mxu1 %vm123_vm4, %v2100_v50 }
0x28be   :  { %2733 = vmatprep.mubr.msk.f32.mxu1 %vm2961_vm0, %v2960_v0  ;;  %2730 = vmatpush3.msra.mxu1 %v2210_v27 }
0x28bf   :  { %2731 = vmatprep.subr.mxu1 %v2960_v0 }
0x28c0   :  { %2732 = vmatpush3.msra.mxu1 %v2209_v30 }
0x297d   :  { %v2169_v3 = vpop.f32.mrf.mxu1 }
0x297e   :  { %v2174_v5 = vrot.slane %v2169_v3, 2 }
0x297f   :  { %v2717_v36 = vpop.f32.mrf.mxu1 }
0x2980   :  { %v2176_v8 = vadd.f32 %v2174_v5, %v3265_v48  ;;  %v2207_v48 = vld [vmem:[#allocation2 + $0x90] sm:$0xff] }
0x2981   :  { %2719 = vmatpush3.msra.mxu0 %v2207_v48 }
0x2982   :  { %2927 = vtanh.f32 %v2176_v8  ;;  %v2424_v11 = vmul.f32 -1.442695, %v2176_v8  ;;  %2720 = vmatprep.subr.mxu0 %v2960_v0 }
0x2983   :  { %2721 = vmatpush3.msra.mxu0 %v2206_v19 }
0x2984   :  { %2929 = vpow2.f32 %v2424_v11  ;;  %2722 = vmatprep.subr.mxu0 %v2960_v0 }
0x2985   :  { %2723 = vmatpush3.msra.mxu0 %v2205_v20 }
0x2986   :  { %2724 = vmatprep.subr.mxu0 %v2960_v0 }
0x2987   :  { %2725 = vmatpush3.msra.mxu0 %v2204_v21 }
0x298f   :  { %v2928_v9 = vpop.eup %2927 }
0x2990   :  { %2189 = vrot.lane.b32.xlu1 %v2928_v9, %s2962_s0 }
0x2991   :  { %v2930_v12 = vpop.eup %2929 }
0x2992   :  { %v2180_v13 = vadd.f32 1.0, %v2930_v12 }
0x2994   :  { %2931 = vrcp.f32 %v2180_v13 }
0x29a1   :  { %v2932_v15 = vpop.eup %2931 }
0x29a2   :  { %v2187_v16 = vmul.f32 %v2932_v15, %v2185_v10 }
0x2a02   :  { %v2190_v45 = vpop.permute.xlu1 %2189 }
0x2a03   :  { %v2192_v14 = vmul.f32 %v2932_v15, %v2190_v45 }
0x2a05   :  { %2194 = vrot.lane.b32.xlu0 %v2192_v14, %s2962_s0 }
0x2a77   :  { %v2195_v17 = vpop.permute.xlu0 %2194 }
0x2a78   :  { %v2197_v18 = vadd.f32 %v2195_v17, %v2187_v16 }
0x2a7a   :  { %2933 = vtanh.f32 %v2197_v18 }
0x2a87   :  { %v2934_v22 = vpop.eup %2933 }
0x2a88   :  { %2200 = vrot.lane.b32.xlu1 %v2934_v22, %s2962_s0 }
0x2afa   :  { %v2201_v23 = vpop.permute.xlu1 %2200 }
0x2afb   :  { %v2203_v24 = vmul.f32 %v2932_v15, %v2201_v23 }
0x2afd   :  { %v2217_v25 = vrot.slane %v2203_v24, 6 }
0x2aff   :  { %2218 = vrot.lane.b32.xlu0 %v2217_v25, %s2963_s19 }
0x2b71   :  { %v2219_v26 = vpop.permute.xlu0 %2218 }
0x2b72   :  { %2727 = vmatmul.mubr.msk.f32.vlgmr.msra.gmra.mxu0 %vm123_vm4, %v2219_v26 }
0x2c32   :  { %v2288_v29 = vpop.f32.mrf.mxu0 }
0x2c33   :  { %v2289_v31 = vadd.f32 %v2425_v28, %v2288_v29 }
0x2c34   :  { %v2728_v32 = vpop.f32.mrf.mxu0 }
0x2c35   :  { %vm2292_vm10 = vcmp.gt.f32.partialorder %v2289_v31, 0.0  ;;  %v2293_v34 = vmul.f32 0.01, %v2289_v31 }
0x2c37   :  { %v2294_v33 = vsel %vm2292_vm10, %v2289_v31, %v2293_v34 }
0x2c38   :  { %2734 = vmatmul.mubr.msk.f32.vlgmr.msra.gmra.mxu1 %vm2299_vm11, %v2294_v33 }
0x2cf8   :  { %v2369_v37 = vpop.f32.mrf.mxu1 }
0x2cf9   :  { %v2370_v38 = vadd.f32 %v2427_v35, %v2369_v37 }
0x2cfa   :  { %v2735_v39 = vpop.f32.mrf.mxu1 }
0x2cfb   :  { %2374 = vst.msk [vmem:[%s3380_s2] sm:$0x3] %vm2373_vm12, %v2370_v38 }
0x2cfc   :  { %2379 = vsyncpa [#allocation3], 1 }

</bundles_post_ra>
